<compile_context>
chip_gen: v7x
topology: tpu7x:2x2x1
jax: 0.10.0
libtpu: 0.0.40
codegen_flags: <defaults>
</compile_context>

<pallas_src>
import jax
import jax.numpy as jnp
from jax.experimental import pallas as pl
from jax.experimental.pallas import tpu as pltpu

BN_EPS = 1e-5  # PyTorch BatchNorm2d default


def _round_up(x, m):
    return (x + m - 1) // m * m


def _cparams(block_bytes):
    # Per-call VMEM limit from actual block footprints (x4 headroom for
    # double-buffering + compiler scratch), capped below v7x's 64 MiB/TC.
    limit = int(min(60 * 1024 * 1024, max(8 * 1024 * 1024, 4 * block_bytes)))
    return pltpu.CompilerParams(dimension_semantics=("parallel",),
                                vmem_limit_bytes=limit)


# ------------------------------ Pallas kernels --------------------------------

def _matmul_kernel(x_ref, w_ref, o_ref):
    # x: (TM, K) bf16, w: (K, Np) bf16 -> o: (TM, Np); f32 MXU accumulation.
    o_ref[...] = jnp.dot(x_ref[...], w_ref[...],
                         preferred_element_type=jnp.float32).astype(o_ref.dtype)


def _matmul_bias_tanh_kernel(x_ref, w_ref, b_ref, o_ref):
    # Final head: conv matmul + bias + tanh fused; lane-dense f32 stores.
    acc = jnp.dot(x_ref[...], w_ref[...], preferred_element_type=jnp.float32)
    o_ref[...] = jnp.tanh(acc + b_ref[...])


def _bn_relu_kernel(x_ref, s_ref, t_ref, o_ref):
    # y = max(x*scale + shift, 0) cast to bf16 on a lane-dense (TR, 128) view.
    x = x_ref[...].astype(jnp.float32)
    o_ref[...] = jnp.maximum(x * s_ref[...] + t_ref[...], 0.0).astype(o_ref.dtype)


# ------------------------------ Pallas wrappers --------------------------------

def _matmul(x, w, out_dtype=jnp.bfloat16, bias_row=None):
    """(M, K) bf16 @ (K, Np) bf16, tiled over M; optional fused bias+tanh."""
    m, k = x.shape
    np_ = w.shape[1]
    # Aim for >=4 grid steps (pipelining) with tm <= 256 (so the big layers
    # shard across both v7x TensorCores); tm multiple of 16 for bf16 packing.
    tm = min(256, max(16, _round_up(-(-m // 4), 16)))
    mp = _round_up(m, tm)
    if mp != m:
        x = jnp.pad(x, ((0, mp - m), (0, 0)))

    in_specs = [pl.BlockSpec((tm, k), lambda i: (i, 0)),
                pl.BlockSpec((k, np_), lambda i: (0, 0))]   # weights stay VMEM-resident
    args = [x, w]
    if bias_row is None:
        kernel = _matmul_kernel
    else:
        kernel = _matmul_bias_tanh_kernel
        in_specs.append(pl.BlockSpec((1, np_), lambda i: (0, 0)))
        args.append(bias_row)
        out_dtype = jnp.float32                              # head stays f32

    out_bytes = jnp.dtype(out_dtype).itemsize
    block_bytes = 2 * tm * k * 2 + 2 * k * np_ * 2 + 2 * tm * np_ * out_bytes
    out = pl.pallas_call(
        kernel,
        out_shape=jax.ShapeDtypeStruct((mp, np_), out_dtype),
        grid=(mp // tm,),
        in_specs=in_specs,
        out_specs=pl.BlockSpec((tm, np_), lambda i: (i, 0)),
        compiler_params=_cparams(block_bytes),
    )(*args)
    return out[:m]


def _batchnorm_relu(h, gamma, beta):
    """Training-mode BatchNorm2d + ReLU, emitting bf16 for the next matmul.

    Per-channel batch mean/var are a tiny plain-jnp reduction; the
    scale/shift + ReLU + cast apply runs in a Pallas kernel on a lane-dense
    (rows, 128) folded view so all stores are unmasked 128-wide.
    """
    n, hh, ww, c = h.shape
    hf = h.astype(jnp.float32)
    mean = jnp.mean(hf, axis=(0, 1, 2))
    var = jnp.mean(jnp.square(hf - mean), axis=(0, 1, 2))    # biased, training-mode
    scale = gamma * jax.lax.rsqrt(var + BN_EPS)
    shift = beta - mean * scale

    if c % 128 == 0:
        lanes = c
    else:
        assert 128 % c == 0, c
        lanes = 128
    reps = lanes // c
    srow = jnp.tile(scale, reps).reshape(1, lanes)
    trow = jnp.tile(shift, reps).reshape(1, lanes)

    total = n * hh * ww * c
    assert total % lanes == 0
    rows = total // lanes
    tr = max(16, rows // 4)
    if rows % tr:
        tr = rows
    out = pl.pallas_call(
        _bn_relu_kernel,
        out_shape=jax.ShapeDtypeStruct((rows, lanes), jnp.bfloat16),
        grid=(rows // tr,),
        in_specs=[pl.BlockSpec((tr, lanes), lambda i: (i, 0)),
                  pl.BlockSpec((1, lanes), lambda i: (0, 0)),
                  pl.BlockSpec((1, lanes), lambda i: (0, 0))],
        out_specs=pl.BlockSpec((tr, lanes), lambda i: (i, 0)),
        compiler_params=_cparams(4 * tr * lanes * 4),
    )(h.reshape(rows, lanes), srow, trow)
    return out.reshape(n, hh, ww, c)


# -------------------------- sub-pixel ConvTranspose2d ---------------------------

def _build_patches(h):
    """im2col patches for the 2x2 stride-1 convs shared by all 4 output phases."""
    n, hh, ww, c = h.shape
    hp = jnp.pad(h, ((0, 0), (1, 1), (1, 1), (0, 0)))
    taps = [hp[:, a:a + hh + 1, b:b + ww + 1, :] for a in (0, 1) for b in (0, 1)]
    return jnp.concatenate(taps, axis=-1).reshape(n * (hh + 1) * (ww + 1), 4 * c)


def _assemble_output(y, n, hh, ww, cout):
    """Depth-to-space assembly of the 4 phase outputs -> (N, 2H, 2W, Cout)."""
    y = y[:, :4 * cout].reshape(n, hh + 1, ww + 1, 2, 2, cout)
    ph = jnp.stack([y[:, dh:dh + hh, dw:dw + ww, dh, dw, :]
                    for dh in (0, 1) for dw in (0, 1)], axis=3)
    ph = ph.reshape(n, hh, ww, 2, 2, cout)
    return jnp.transpose(ph, (0, 1, 3, 2, 4, 5)).reshape(n, 2 * hh, 2 * ww, cout)


def _conv_transpose_s2(h, wmat, cout, bias_row=None):
    """ConvTranspose2d(k=4, s=2, p=1) via sub-pixel matmul + depth-to-space."""
    n, hh, ww, _ = h.shape
    patches = _build_patches(h)                               # (M, 4*Cin) bf16
    y = _matmul(patches, wmat,
                out_dtype=jnp.bfloat16 if bias_row is None else jnp.float32,
                bias_row=bias_row)
    return _assemble_output(y, n, hh, ww, cout)


# ------------------------------ Generator forward ------------------------------

def prep_params(params):
    """One-time weight prep (hoisted out of the forward pass): sub-pixel phase
    matrices, lane padding to multiples of 128, bf16 cast."""

    def subpixel_weight(w):                                   # (Cin, Cout, 4, 4)
        cin, cout = w.shape[0], w.shape[1]
        taps = []
        for a in (0, 1):
            for b in (0, 1):
                phases = [w[:, :, 3 - dh - 2 * a, 3 - dw - 2 * b]
                          for dh in (0, 1) for dw in (0, 1)]
                taps.append(jnp.concatenate(phases, axis=1))  # (Cin, 4*Cout)
        wp = jnp.concatenate(taps, axis=0)                    # (4*Cin, 4*Cout)
        np_ = _round_up(4 * cout, 128)
        return jnp.pad(wp, ((0, 0), (0, np_ - 4 * cout))).astype(jnp.bfloat16)

    w1 = params["w1"]                                         # stride 1, pad 0, 1x1 input
    cin1, cout1 = w1.shape[0], w1.shape[1]
    w1m = jnp.transpose(w1, (0, 2, 3, 1)).reshape(cin1, 16 * cout1)
    w1m = jnp.pad(w1m, ((0, 0), (0, _round_up(16 * cout1, 128) - 16 * cout1)))

    cimg = params["w5"].shape[1]
    b5 = jnp.tile(params["bias5"], 4)                         # one copy per output phase
    b5row = jnp.pad(b5, (0, _round_up(4 * cimg, 128) - 4 * cimg)).reshape(1, -1)

    return {
        "embed": params["embed"],
        "w1m": w1m.astype(jnp.bfloat16), "g1": params["g1"], "b1": params["b1"],
        "w2m": subpixel_weight(params["w2"]), "g2": params["g2"], "b2": params["b2"],
        "w3m": subpixel_weight(params["w3"]), "g3": params["g3"], "b3": params["b3"],
        "w4m": subpixel_weight(params["w4"]), "g4": params["g4"], "b4": params["b4"],
        "w5m": subpixel_weight(params["w5"]), "bias5": params["bias5"], "b5row": b5row,
    }


def generator_forward(prepped, x_nchw, labels):
    n = x_nchw.shape[0]
    emb = prepped["embed"][labels]                            # (N, embedSize)
    z = x_nchw.reshape(n, -1)                                 # (N, zDim); H=W=1
    h0 = jnp.concatenate([z, emb], axis=1).astype(jnp.bfloat16)

    # Layer 1: ConvTranspose2d(k=4, s=1, p=0) on a 1x1 input == plain matmul.
    cout1 = prepped["g1"].shape[0]
    y1 = _matmul(h0, prepped["w1m"], out_dtype=jnp.bfloat16)
    h = y1[:, :16 * cout1].reshape(n, 4, 4, cout1)            # raw conv output, NHWC
    h = _batchnorm_relu(h, prepped["g1"], prepped["b1"])

    # Layers 2-4: sub-pixel ConvT -> BatchNorm (batch stats) -> ReLU.
    for i in (2, 3, 4):
        cout = prepped[f"g{i}"].shape[0]
        h = _conv_transpose_s2(h, prepped[f"w{i}m"], cout)
        h = _batchnorm_relu(h, prepped[f"g{i}"], prepped[f"b{i}"])

    # Layer 5: sub-pixel ConvT with bias + tanh fused into the matmul epilogue.
    cimg = prepped["bias5"].shape[0]
    out = _conv_transpose_s2(h, prepped["w5m"], cimg, bias_row=prepped["b5row"])
    return jnp.transpose(out, (0, 3, 1, 2))                   # NHWC -> NCHW


def init_params(key, zDim, channelImages, featuresG, nClasses, embedSize):
    keys = jax.random.split(key, 7)

    def conv_w(k, cin, cout):
        return jax.random.normal(k, (cin, cout, 4, 4), jnp.float32) * 0.05

    f = featuresG
    return {
        "embed": jax.random.normal(keys[0], (nClasses, embedSize), jnp.float32),
        "w1": conv_w(keys[1], zDim + embedSize, f * 16),
        "g1": jnp.ones((f * 16,), jnp.float32), "b1": jnp.zeros((f * 16,), jnp.float32),
        "w2": conv_w(keys[2], f * 16, f * 8),
        "g2": jnp.ones((f * 8,), jnp.float32), "b2": jnp.zeros((f * 8,), jnp.float32),
        "w3": conv_w(keys[3], f * 8, f * 4),
        "g3": jnp.ones((f * 4,), jnp.float32), "b3": jnp.zeros((f * 4,), jnp.float32),
        "w4": conv_w(keys[4], f * 4, f * 2),
        "g4": jnp.ones((f * 2,), jnp.float32), "b4": jnp.zeros((f * 2,), jnp.float32),
        "w5": conv_w(keys[5], f * 2, channelImages),
        "bias5": jax.random.normal(keys[6], (channelImages,), jnp.float32) * 0.05,
    }


if __name__ == "__main__":
    zDim, channelImages, featuresG = 16, 3, 8
    nClasses, imageSize, embedSize = 10, 64, 8
    N = 2

    key = jax.random.PRNGKey(0)
    kp, kx, kl = jax.random.split(key, 3)
    params = init_params(kp, zDim, channelImages, featuresG, nClasses, embedSize)
    prepped = prep_params(params)        # hoisted one-time weight preprocessing

    x = jax.random.normal(kx, (N, zDim, 1, 1), jnp.float32)
    labels = jax.random.randint(kl, (N,), 0, nClasses)

    out = jax.jit(generator_forward)(prepped, x, labels)
    jax.block_until_ready(out)
    assert out.shape == (N, channelImages, 64, 64), out.shape
    assert bool(jnp.all(jnp.isfinite(out)))
    print("KERNEL_OK")
</pallas_src>

<mosaic_0001>
module attributes {stable_mosaic.version = 11 : i64} {
  func.func @_matmul_kernel(%arg0: i32, %arg1: memref<16x24xbf16, #tpu.memory_space<vmem>>, %arg2: memref<24x2048xbf16, #tpu.memory_space<vmem>>, %arg3: memref<16x2048xbf16, #tpu.memory_space<vmem>>) attributes {dimension_semantics = [#tpu.dimension_semantics<parallel>], iteration_bounds = array<i64: 1>, scalar_prefetch = 0 : i64, scratch_operands = 0 : i64, tpu.core_type = #tpu.core_type<tc>, window_params = [{transform_indices = @transform_0, window_bounds = array<i64: 16, 24>}, {pipeline_mode = #tpu.pipeline_mode<synchronous>, transform_indices = @transform_1, window_bounds = array<i64: 24, 2048>}, {transform_indices = @transform_2, window_bounds = array<i64: 16, 2048>}]} {
    %c0 = arith.constant 0 : index
    %c0_0 = arith.constant 0 : index
    %0 = vector.load %arg1[%c0, %c0_0] : memref<16x24xbf16, #tpu.memory_space<vmem>>, vector<16x24xbf16>
    %c0_1 = arith.constant 0 : index
    %c0_2 = arith.constant 0 : index
    %1 = vector.load %arg2[%c0_1, %c0_2] : memref<24x2048xbf16, #tpu.memory_space<vmem>>, vector<24x2048xbf16>
    %cst = arith.constant dense<0.000000e+00> : vector<16x2048xf32>
    %2 = tpu.matmul %0, %1, %cst {dimension_numbers = #tpu.dot_dimension_numbers<[1], [0], [0], [1], [0, 0, 1, 1], [], []>} : vector<16x24xbf16>, vector<24x2048xbf16>, vector<16x2048xf32> -> vector<16x2048xf32>
    %3 = arith.truncf %2 : vector<16x2048xf32> to vector<16x2048xbf16>
    %c0_3 = arith.constant 0 : index
    %c0_4 = arith.constant 0 : index
    %4 = vector.load %arg3[%c0_3, %c0_4] : memref<16x2048xbf16, #tpu.memory_space<vmem>>, vector<16x2048xbf16>
    tpu.vector_store %arg3[%c0_3, %c0_4], %3 {strides = array<i32>} : memref<16x2048xbf16, #tpu.memory_space<vmem>>, vector<16x2048xbf16>,
    return
  }
  func.func @transform_0(%arg0: i32) -> (i32, i32) {
    %c0_i32 = arith.constant 0 : i32
    %c0_i32_0 = arith.constant 0 : i32
    return %arg0, %c0_i32 : i32, i32
  }
  func.func @transform_1(%arg0: i32) -> (i32, i32) {
    %c0_i32 = arith.constant 0 : i32
    %c0_i32_0 = arith.constant 0 : i32
    %c0_i32_1 = arith.constant 0 : i32
    return %c0_i32, %c0_i32_0 : i32, i32
  }
  func.func @transform_2(%arg0: i32) -> (i32, i32) {
    %c0_i32 = arith.constant 0 : i32
    %c0_i32_0 = arith.constant 0 : i32
    return %arg0, %c0_i32 : i32, i32
  }
}

module attributes {stable_mosaic.version = 11 : i64} {
  func.func @_bn_relu_kernel(%arg0: i32, %arg1: memref<16x128xbf16, #tpu.memory_space<vmem>>, %arg2: memref<1x128xf32, #tpu.memory_space<vmem>>, %arg3: memref<1x128xf32, #tpu.memory_space<vmem>>, %arg4: memref<16x128xbf16, #tpu.memory_space<vmem>>) attributes {dimension_semantics = [#tpu.dimension_semantics<parallel>], iteration_bounds = array<i64: 2>, scalar_prefetch = 0 : i64, scratch_operands = 0 : i64, tpu.core_type = #tpu.core_type<tc>, window_params = [{transform_indices = @transform_0, window_bounds = array<i64: 16, 128>}, {pipeline_mode = #tpu.pipeline_mode<synchronous>, transform_indices = @transform_1, window_bounds = array<i64: 1, 128>}, {pipeline_mode = #tpu.pipeline_mode<synchronous>, transform_indices = @transform_2, window_bounds = array<i64: 1, 128>}, {transform_indices = @transform_3, window_bounds = array<i64: 16, 128>}]} {
    %c0 = arith.constant 0 : index
    %c0_0 = arith.constant 0 : index
    %0 = vector.load %arg1[%c0, %c0_0] : memref<16x128xbf16, #tpu.memory_space<vmem>>, vector<16x128xbf16>
    %1 = arith.extf %0 : vector<16x128xbf16> to vector<16x128xf32>
    %c0_1 = arith.constant 0 : index
    %c0_2 = arith.constant 0 : index
    %2 = vector.load %arg2[%c0_1, %c0_2] : memref<1x128xf32, #tpu.memory_space<vmem>>, vector<1x128xf32>
    %3 = vector.broadcast %2 : vector<1x128xf32> to vector<16x128xf32>
    %4 = arith.mulf %1, %3 : vector<16x128xf32>
    %c0_3 = arith.constant 0 : index
    %c0_4 = arith.constant 0 : index
    %5 = vector.load %arg3[%c0_3, %c0_4] : memref<1x128xf32, #tpu.memory_space<vmem>>, vector<1x128xf32>
    %6 = vector.broadcast %5 : vector<1x128xf32> to vector<16x128xf32>
    %7 = arith.addf %4, %6 : vector<16x128xf32>
    %cst = arith.constant 0.000000e+00 : f32
    %8 = vector.broadcast %cst : f32 to vector<16x128xf32>
    %9 = arith.maximumf %7, %8 : vector<16x128xf32>
    %10 = arith.truncf %9 : vector<16x128xf32> to vector<16x128xbf16>
    %c0_5 = arith.constant 0 : index
    %c0_6 = arith.constant 0 : index
    %11 = vector.load %arg4[%c0_5, %c0_6] : memref<16x128xbf16, #tpu.memory_space<vmem>>, vector<16x128xbf16>
    tpu.vector_store %arg4[%c0_5, %c0_6], %10 {strides = array<i32>} : memref<16x128xbf16, #tpu.memory_space<vmem>>, vector<16x128xbf16>,
    return
  }
  func.func @transform_0(%arg0: i32) -> (i32, i32) {
    %c0_i32 = arith.constant 0 : i32
    %c0_i32_0 = arith.constant 0 : i32
    return %arg0, %c0_i32 : i32, i32
  }
  func.func @transform_1(%arg0: i32) -> (i32, i32) {
    %c0_i32 = arith.constant 0 : i32
    %c0_i32_0 = arith.constant 0 : i32
    %c0_i32_1 = arith.constant 0 : i32
    return %c0_i32, %c0_i32_0 : i32, i32
  }
  func.func @transform_2(%arg0: i32) -> (i32, i32) {
    %c0_i32 = arith.constant 0 : i32
    %c0_i32_0 = arith.constant 0 : i32
    %c0_i32_1 = arith.constant 0 : i32
    return %c0_i32, %c0_i32_0 : i32, i32
  }
  func.func @transform_3(%arg0: i32) -> (i32, i32) {
    %c0_i32 = arith.constant 0 : i32
    %c0_i32_0 = arith.constant 0 : i32
    return %arg0, %c0_i32 : i32, i32
  }
}

module attributes {stable_mosaic.version = 11 : i64} {
  func.func @_matmul_kernel(%arg0: i32, %arg1: memref<16x512xbf16, #tpu.memory_space<vmem>>, %arg2: memref<512x256xbf16, #tpu.memory_space<vmem>>, %arg3: memref<16x256xbf16, #tpu.memory_space<vmem>>) attributes {dimension_semantics = [#tpu.dimension_semantics<parallel>], iteration_bounds = array<i64: 4>, scalar_prefetch = 0 : i64, scratch_operands = 0 : i64, tpu.core_type = #tpu.core_type<tc>, window_params = [{transform_indices = @transform_0, window_bounds = array<i64: 16, 512>}, {pipeline_mode = #tpu.pipeline_mode<synchronous>, transform_indices = @transform_1, window_bounds = array<i64: 512, 256>}, {transform_indices = @transform_2, window_bounds = array<i64: 16, 256>}]} {
    %c0 = arith.constant 0 : index
    %c0_0 = arith.constant 0 : index
    %0 = vector.load %arg1[%c0, %c0_0] : memref<16x512xbf16, #tpu.memory_space<vmem>>, vector<16x512xbf16>
    %c0_1 = arith.constant 0 : index
    %c0_2 = arith.constant 0 : index
    %1 = vector.load %arg2[%c0_1, %c0_2] : memref<512x256xbf16, #tpu.memory_space<vmem>>, vector<512x256xbf16>
    %cst = arith.constant dense<0.000000e+00> : vector<16x256xf32>
    %2 = tpu.matmul %0, %1, %cst {dimension_numbers = #tpu.dot_dimension_numbers<[1], [0], [0], [1], [0, 0, 1, 1], [], []>} : vector<16x512xbf16>, vector<512x256xbf16>, vector<16x256xf32> -> vector<16x256xf32>
    %3 = arith.truncf %2 : vector<16x256xf32> to vector<16x256xbf16>
    %c0_3 = arith.constant 0 : index
    %c0_4 = arith.constant 0 : index
    %4 = vector.load %arg3[%c0_3, %c0_4] : memref<16x256xbf16, #tpu.memory_space<vmem>>, vector<16x256xbf16>
    tpu.vector_store %arg3[%c0_3, %c0_4], %3 {strides = array<i32>} : memref<16x256xbf16, #tpu.memory_space<vmem>>, vector<16x256xbf16>,
    return
  }
  func.func @transform_0(%arg0: i32) -> (i32, i32) {
    %c0_i32 = arith.constant 0 : i32
    %c0_i32_0 = arith.constant 0 : i32
    return %arg0, %c0_i32 : i32, i32
  }
  func.func @transform_1(%arg0: i32) -> (i32, i32) {
    %c0_i32 = arith.constant 0 : i32
    %c0_i32_0 = arith.constant 0 : i32
    %c0_i32_1 = arith.constant 0 : i32
    return %c0_i32, %c0_i32_0 : i32, i32
  }
  func.func @transform_2(%arg0: i32) -> (i32, i32) {
    %c0_i32 = arith.constant 0 : i32
    %c0_i32_0 = arith.constant 0 : i32
    return %arg0, %c0_i32 : i32, i32
  }
}

module attributes {stable_mosaic.version = 11 : i64} {
  func.func @_bn_relu_kernel(%arg0: i32, %arg1: memref<16x128xbf16, #tpu.memory_space<vmem>>, %arg2: memref<1x128xf32, #tpu.memory_space<vmem>>, %arg3: memref<1x128xf32, #tpu.memory_space<vmem>>, %arg4: memref<16x128xbf16, #tpu.memory_space<vmem>>) attributes {dimension_semantics = [#tpu.dimension_semantics<parallel>], iteration_bounds = array<i64: 4>, scalar_prefetch = 0 : i64, scratch_operands = 0 : i64, tpu.core_type = #tpu.core_type<tc>, window_params = [{transform_indices = @transform_0, window_bounds = array<i64: 16, 128>}, {pipeline_mode = #tpu.pipeline_mode<synchronous>, transform_indices = @transform_1, window_bounds = array<i64: 1, 128>}, {pipeline_mode = #tpu.pipeline_mode<synchronous>, transform_indices = @transform_2, window_bounds = array<i64: 1, 128>}, {transform_indices = @transform_3, window_bounds = array<i64: 16, 128>}]} {
    %c0 = arith.constant 0 : index
    %c0_0 = arith.constant 0 : index
    %0 = vector.load %arg1[%c0, %c0_0] : memref<16x128xbf16, #tpu.memory_space<vmem>>, vector<16x128xbf16>
    %1 = arith.extf %0 : vector<16x128xbf16> to vector<16x128xf32>
    %c0_1 = arith.constant 0 : index
    %c0_2 = arith.constant 0 : index
    %2 = vector.load %arg2[%c0_1, %c0_2] : memref<1x128xf32, #tpu.memory_space<vmem>>, vector<1x128xf32>
    %3 = vector.broadcast %2 : vector<1x128xf32> to vector<16x128xf32>
    %4 = arith.mulf %1, %3 : vector<16x128xf32>
    %c0_3 = arith.constant 0 : index
    %c0_4 = arith.constant 0 : index
    %5 = vector.load %arg3[%c0_3, %c0_4] : memref<1x128xf32, #tpu.memory_space<vmem>>, vector<1x128xf32>
    %6 = vector.broadcast %5 : vector<1x128xf32> to vector<16x128xf32>
    %7 = arith.addf %4, %6 : vector<16x128xf32>
    %cst = arith.constant 0.000000e+00 : f32
    %8 = vector.broadcast %cst : f32 to vector<16x128xf32>
    %9 = arith.maximumf %7, %8 : vector<16x128xf32>
    %10 = arith.truncf %9 : vector<16x128xf32> to vector<16x128xbf16>
    %c0_5 = arith.constant 0 : index
    %c0_6 = arith.constant 0 : index
    %11 = vector.load %arg4[%c0_5, %c0_6] : memref<16x128xbf16, #tpu.memory_space<vmem>>, vector<16x128xbf16>
    tpu.vector_store %arg4[%c0_5, %c0_6], %10 {strides = array<i32>} : memref<16x128xbf16, #tpu.memory_space<vmem>>, vector<16x128xbf16>,
    return
  }
  func.func @transform_0(%arg0: i32) -> (i32, i32) {
    %c0_i32 = arith.constant 0 : i32
    %c0_i32_0 = arith.constant 0 : i32
    return %arg0, %c0_i32 : i32, i32
  }
  func.func @transform_1(%arg0: i32) -> (i32, i32) {
    %c0_i32 = arith.constant 0 : i32
    %c0_i32_0 = arith.constant 0 : i32
    %c0_i32_1 = arith.constant 0 : i32
    return %c0_i32, %c0_i32_0 : i32, i32
  }
  func.func @transform_2(%arg0: i32) -> (i32, i32) {
    %c0_i32 = arith.constant 0 : i32
    %c0_i32_0 = arith.constant 0 : i32
    %c0_i32_1 = arith.constant 0 : i32
    return %c0_i32, %c0_i32_0 : i32, i32
  }
  func.func @transform_3(%arg0: i32) -> (i32, i32) {
    %c0_i32 = arith.constant 0 : i32
    %c0_i32_0 = arith.constant 0 : i32
    return %arg0, %c0_i32 : i32, i32
  }
}

module attributes {stable_mosaic.version = 11 : i64} {
  func.func @_matmul_kernel(%arg0: i32, %arg1: memref<48x256xbf16, #tpu.memory_space<vmem>>, %arg2: memref<256x128xbf16, #tpu.memory_space<vmem>>, %arg3: memref<48x128xbf16, #tpu.memory_space<vmem>>) attributes {dimension_semantics = [#tpu.dimension_semantics<parallel>], iteration_bounds = array<i64: 4>, scalar_prefetch = 0 : i64, scratch_operands = 0 : i64, tpu.core_type = #tpu.core_type<tc>, window_params = [{transform_indices = @transform_0, window_bounds = array<i64: 48, 256>}, {pipeline_mode = #tpu.pipeline_mode<synchronous>, transform_indices = @transform_1, window_bounds = array<i64: 256, 128>}, {transform_indices = @transform_2, window_bounds = array<i64: 48, 128>}]} {
    %c0 = arith.constant 0 : index
    %c0_0 = arith.constant 0 : index
    %0 = vector.load %arg1[%c0, %c0_0] : memref<48x256xbf16, #tpu.memory_space<vmem>>, vector<48x256xbf16>
    %c0_1 = arith.constant 0 : index
    %c0_2 = arith.constant 0 : index
    %1 = vector.load %arg2[%c0_1, %c0_2] : memref<256x128xbf16, #tpu.memory_space<vmem>>, vector<256x128xbf16>
    %cst = arith.constant dense<0.000000e+00> : vector<48x128xf32>
    %2 = tpu.matmul %0, %1, %cst {dimension_numbers = #tpu.dot_dimension_numbers<[1], [0], [0], [1], [0, 0, 1, 1], [], []>} : vector<48x256xbf16>, vector<256x128xbf16>, vector<48x128xf32> -> vector<48x128xf32>
    %3 = arith.truncf %2 : vector<48x128xf32> to vector<48x128xbf16>
    %c0_3 = arith.constant 0 : index
    %c0_4 = arith.constant 0 : index
    %4 = vector.load %arg3[%c0_3, %c0_4] : memref<48x128xbf16, #tpu.memory_space<vmem>>, vector<48x128xbf16>
    tpu.vector_store %arg3[%c0_3, %c0_4], %3 {strides = array<i32>} : memref<48x128xbf16, #tpu.memory_space<vmem>>, vector<48x128xbf16>,
    return
  }
  func.func @transform_0(%arg0: i32) -> (i32, i32) {
    %c0_i32 = arith.constant 0 : i32
    %c0_i32_0 = arith.constant 0 : i32
    return %arg0, %c0_i32 : i32, i32
  }
  func.func @transform_1(%arg0: i32) -> (i32, i32) {
    %c0_i32 = arith.constant 0 : i32
    %c0_i32_0 = arith.constant 0 : i32
    %c0_i32_1 = arith.constant 0 : i32
    return %c0_i32, %c0_i32_0 : i32, i32
  }
  func.func @transform_2(%arg0: i32) -> (i32, i32) {
    %c0_i32 = arith.constant 0 : i32
    %c0_i32_0 = arith.constant 0 : i32
    return %arg0, %c0_i32 : i32, i32
  }
}

module attributes {stable_mosaic.version = 11 : i64} {
  func.func @_bn_relu_kernel(%arg0: i32, %arg1: memref<32x128xbf16, #tpu.memory_space<vmem>>, %arg2: memref<1x128xf32, #tpu.memory_space<vmem>>, %arg3: memref<1x128xf32, #tpu.memory_space<vmem>>, %arg4: memref<32x128xbf16, #tpu.memory_space<vmem>>) attributes {dimension_semantics = [#tpu.dimension_semantics<parallel>], iteration_bounds = array<i64: 4>, scalar_prefetch = 0 : i64, scratch_operands = 0 : i64, tpu.core_type = #tpu.core_type<tc>, window_params = [{transform_indices = @transform_0, window_bounds = array<i64: 32, 128>}, {pipeline_mode = #tpu.pipeline_mode<synchronous>, transform_indices = @transform_1, window_bounds = array<i64: 1, 128>}, {pipeline_mode = #tpu.pipeline_mode<synchronous>, transform_indices = @transform_2, window_bounds = array<i64: 1, 128>}, {transform_indices = @transform_3, window_bounds = array<i64: 32, 128>}]} {
    %c0 = arith.constant 0 : index
    %c0_0 = arith.constant 0 : index
    %0 = vector.load %arg1[%c0, %c0_0] : memref<32x128xbf16, #tpu.memory_space<vmem>>, vector<32x128xbf16>
    %1 = arith.extf %0 : vector<32x128xbf16> to vector<32x128xf32>
    %c0_1 = arith.constant 0 : index
    %c0_2 = arith.constant 0 : index
    %2 = vector.load %arg2[%c0_1, %c0_2] : memref<1x128xf32, #tpu.memory_space<vmem>>, vector<1x128xf32>
    %3 = vector.broadcast %2 : vector<1x128xf32> to vector<32x128xf32>
    %4 = arith.mulf %1, %3 : vector<32x128xf32>
    %c0_3 = arith.constant 0 : index
    %c0_4 = arith.constant 0 : index
    %5 = vector.load %arg3[%c0_3, %c0_4] : memref<1x128xf32, #tpu.memory_space<vmem>>, vector<1x128xf32>
    %6 = vector.broadcast %5 : vector<1x128xf32> to vector<32x128xf32>
    %7 = arith.addf %4, %6 : vector<32x128xf32>
    %cst = arith.constant 0.000000e+00 : f32
    %8 = vector.broadcast %cst : f32 to vector<32x128xf32>
    %9 = arith.maximumf %7, %8 : vector<32x128xf32>
    %10 = arith.truncf %9 : vector<32x128xf32> to vector<32x128xbf16>
    %c0_5 = arith.constant 0 : index
    %c0_6 = arith.constant 0 : index
    %11 = vector.load %arg4[%c0_5, %c0_6] : memref<32x128xbf16, #tpu.memory_space<vmem>>, vector<32x128xbf16>
    tpu.vector_store %arg4[%c0_5, %c0_6], %10 {strides = array<i32>} : memref<32x128xbf16, #tpu.memory_space<vmem>>, vector<32x128xbf16>,
    return
  }
  func.func @transform_0(%arg0: i32) -> (i32, i32) {
    %c0_i32 = arith.constant 0 : i32
    %c0_i32_0 = arith.constant 0 : i32
    return %arg0, %c0_i32 : i32, i32
  }
  func.func @transform_1(%arg0: i32) -> (i32, i32) {
    %c0_i32 = arith.constant 0 : i32
    %c0_i32_0 = arith.constant 0 : i32
    %c0_i32_1 = arith.constant 0 : i32
    return %c0_i32, %c0_i32_0 : i32, i32
  }
  func.func @transform_2(%arg0: i32) -> (i32, i32) {
    %c0_i32 = arith.constant 0 : i32
    %c0_i32_0 = arith.constant 0 : i32
    %c0_i32_1 = arith.constant 0 : i32
    return %c0_i32, %c0_i32_0 : i32, i32
  }
  func.func @transform_3(%arg0: i32) -> (i32, i32) {
    %c0_i32 = arith.constant 0 : i32
    %c0_i32_0 = arith.constant 0 : i32
    return %arg0, %c0_i32 : i32, i32
  }
}

module attributes {stable_mosaic.version = 11 : i64} {
  func.func @_matmul_kernel(%arg0: i32, %arg1: memref<160x128xbf16, #tpu.memory_space<vmem>>, %arg2: memref<128x128xbf16, #tpu.memory_space<vmem>>, %arg3: memref<160x128xbf16, #tpu.memory_space<vmem>>) attributes {dimension_semantics = [#tpu.dimension_semantics<parallel>], iteration_bounds = array<i64: 4>, scalar_prefetch = 0 : i64, scratch_operands = 0 : i64, tpu.core_type = #tpu.core_type<tc>, window_params = [{transform_indices = @transform_0, window_bounds = array<i64: 160, 128>}, {pipeline_mode = #tpu.pipeline_mode<synchronous>, transform_indices = @transform_1, window_bounds = array<i64: 128, 128>}, {transform_indices = @transform_2, window_bounds = array<i64: 160, 128>}]} {
    %c0 = arith.constant 0 : index
    %c0_0 = arith.constant 0 : index
    %0 = vector.load %arg1[%c0, %c0_0] : memref<160x128xbf16, #tpu.memory_space<vmem>>, vector<160x128xbf16>
    %c0_1 = arith.constant 0 : index
    %c0_2 = arith.constant 0 : index
    %1 = vector.load %arg2[%c0_1, %c0_2] : memref<128x128xbf16, #tpu.memory_space<vmem>>, vector<128x128xbf16>
    %cst = arith.constant dense<0.000000e+00> : vector<160x128xf32>
    %2 = tpu.matmul %0, %1, %cst {dimension_numbers = #tpu.dot_dimension_numbers<[1], [0], [0], [1], [0, 0, 1, 1], [], []>} : vector<160x128xbf16>, vector<128x128xbf16>, vector<160x128xf32> -> vector<160x128xf32>
    %3 = arith.truncf %2 : vector<160x128xf32> to vector<160x128xbf16>
    %c0_3 = arith.constant 0 : index
    %c0_4 = arith.constant 0 : index
    %4 = vector.load %arg3[%c0_3, %c0_4] : memref<160x128xbf16, #tpu.memory_space<vmem>>, vector<160x128xbf16>
    tpu.vector_store %arg3[%c0_3, %c0_4], %3 {strides = array<i32>} : memref<160x128xbf16, #tpu.memory_space<vmem>>, vector<160x128xbf16>,
    return
  }
  func.func @transform_0(%arg0: i32) -> (i32, i32) {
    %c0_i32 = arith.constant 0 : i32
    %c0_i32_0 = arith.constant 0 : i32
    return %arg0, %c0_i32 : i32, i32
  }
  func.func @transform_1(%arg0: i32) -> (i32, i32) {
    %c0_i32 = arith.constant 0 : i32
    %c0_i32_0 = arith.constant 0 : i32
    %c0_i32_1 = arith.constant 0 : i32
    return %c0_i32, %c0_i32_0 : i32, i32
  }
  func.func @transform_2(%arg0: i32) -> (i32, i32) {
    %c0_i32 = arith.constant 0 : i32
    %c0_i32_0 = arith.constant 0 : i32
    return %arg0, %c0_i32 : i32, i32
  }
}

module attributes {stable_mosaic.version = 11 : i64} {
  func.func @_bn_relu_kernel(%arg0: i32, %arg1: memref<64x128xbf16, #tpu.memory_space<vmem>>, %arg2: memref<1x128xf32, #tpu.memory_space<vmem>>, %arg3: memref<1x128xf32, #tpu.memory_space<vmem>>, %arg4: memref<64x128xbf16, #tpu.memory_space<vmem>>) attributes {dimension_semantics = [#tpu.dimension_semantics<parallel>], iteration_bounds = array<i64: 4>, scalar_prefetch = 0 : i64, scratch_operands = 0 : i64, tpu.core_type = #tpu.core_type<tc>, window_params = [{transform_indices = @transform_0, window_bounds = array<i64: 64, 128>}, {pipeline_mode = #tpu.pipeline_mode<synchronous>, transform_indices = @transform_1, window_bounds = array<i64: 1, 128>}, {pipeline_mode = #tpu.pipeline_mode<synchronous>, transform_indices = @transform_2, window_bounds = array<i64: 1, 128>}, {transform_indices = @transform_3, window_bounds = array<i64: 64, 128>}]} {
    %c0 = arith.constant 0 : index
    %c0_0 = arith.constant 0 : index
    %0 = vector.load %arg1[%c0, %c0_0] : memref<64x128xbf16, #tpu.memory_space<vmem>>, vector<64x128xbf16>
    %1 = arith.extf %0 : vector<64x128xbf16> to vector<64x128xf32>
    %c0_1 = arith.constant 0 : index
    %c0_2 = arith.constant 0 : index
    %2 = vector.load %arg2[%c0_1, %c0_2] : memref<1x128xf32, #tpu.memory_space<vmem>>, vector<1x128xf32>
    %3 = vector.broadcast %2 : vector<1x128xf32> to vector<64x128xf32>
    %4 = arith.mulf %1, %3 : vector<64x128xf32>
    %c0_3 = arith.constant 0 : index
    %c0_4 = arith.constant 0 : index
    %5 = vector.load %arg3[%c0_3, %c0_4] : memref<1x128xf32, #tpu.memory_space<vmem>>, vector<1x128xf32>
    %6 = vector.broadcast %5 : vector<1x128xf32> to vector<64x128xf32>
    %7 = arith.addf %4, %6 : vector<64x128xf32>
    %cst = arith.constant 0.000000e+00 : f32
    %8 = vector.broadcast %cst : f32 to vector<64x128xf32>
    %9 = arith.maximumf %7, %8 : vector<64x128xf32>
    %10 = arith.truncf %9 : vector<64x128xf32> to vector<64x128xbf16>
    %c0_5 = arith.constant 0 : index
    %c0_6 = arith.constant 0 : index
    %11 = vector.load %arg4[%c0_5, %c0_6] : memref<64x128xbf16, #tpu.memory_space<vmem>>, vector<64x128xbf16>
    tpu.vector_store %arg4[%c0_5, %c0_6], %10 {strides = array<i32>} : memref<64x128xbf16, #tpu.memory_space<vmem>>, vector<64x128xbf16>,
    return
  }
  func.func @transform_0(%arg0: i32) -> (i32, i32) {
    %c0_i32 = arith.constant 0 : i32
    %c0_i32_0 = arith.constant 0 : i32
    return %arg0, %c0_i32 : i32, i32
  }
  func.func @transform_1(%arg0: i32) -> (i32, i32) {
    %c0_i32 = arith.constant 0 : i32
    %c0_i32_0 = arith.constant 0 : i32
    %c0_i32_1 = arith.constant 0 : i32
    return %c0_i32, %c0_i32_0 : i32, i32
  }
  func.func @transform_2(%arg0: i32) -> (i32, i32) {
    %c0_i32 = arith.constant 0 : i32
    %c0_i32_0 = arith.constant 0 : i32
    %c0_i32_1 = arith.constant 0 : i32
    return %c0_i32, %c0_i32_0 : i32, i32
  }
  func.func @transform_3(%arg0: i32) -> (i32, i32) {
    %c0_i32 = arith.constant 0 : i32
    %c0_i32_0 = arith.constant 0 : i32
    return %arg0, %c0_i32 : i32, i32
  }
}

module attributes {stable_mosaic.version = 11 : i64} {
  func.func @_matmul_bias_tanh_kernel(%arg0: i32, %arg1: memref<256x64xbf16, #tpu.memory_space<vmem>>, %arg2: memref<64x128xbf16, #tpu.memory_space<vmem>>, %arg3: memref<1x128xf32, #tpu.memory_space<vmem>>, %arg4: memref<256x128xf32, #tpu.memory_space<vmem>>) attributes {dimension_semantics = [#tpu.dimension_semantics<parallel>], iteration_bounds = array<i64: 9>, scalar_prefetch = 0 : i64, scratch_operands = 0 : i64, tpu.core_type = #tpu.core_type<tc>, window_params = [{transform_indices = @transform_0, window_bounds = array<i64: 256, 64>}, {pipeline_mode = #tpu.pipeline_mode<synchronous>, transform_indices = @transform_1, window_bounds = array<i64: 64, 128>}, {pipeline_mode = #tpu.pipeline_mode<synchronous>, transform_indices = @transform_2, window_bounds = array<i64: 1, 128>}, {transform_indices = @transform_3, window_bounds = array<i64: 256, 128>}]} {
    %c0 = arith.constant 0 : index
    %c0_0 = arith.constant 0 : index
    %0 = vector.load %arg1[%c0, %c0_0] : memref<256x64xbf16, #tpu.memory_space<vmem>>, vector<256x64xbf16>
    %c0_1 = arith.constant 0 : index
    %c0_2 = arith.constant 0 : index
    %1 = vector.load %arg2[%c0_1, %c0_2] : memref<64x128xbf16, #tpu.memory_space<vmem>>, vector<64x128xbf16>
    %cst = arith.constant dense<0.000000e+00> : vector<256x128xf32>
    %2 = tpu.matmul %0, %1, %cst {dimension_numbers = #tpu.dot_dimension_numbers<[1], [0], [0], [1], [0, 0, 1, 1], [], []>} : vector<256x64xbf16>, vector<64x128xbf16>, vector<256x128xf32> -> vector<256x128xf32>
    %c0_3 = arith.constant 0 : index
    %c0_4 = arith.constant 0 : index
    %3 = vector.load %arg3[%c0_3, %c0_4] : memref<1x128xf32, #tpu.memory_space<vmem>>, vector<1x128xf32>
    %4 = vector.broadcast %3 : vector<1x128xf32> to vector<256x128xf32>
    %5 = arith.addf %2, %4 : vector<256x128xf32>
    %6 = math.tanh %5 : vector<256x128xf32>
    %c0_5 = arith.constant 0 : index
    %c0_6 = arith.constant 0 : index
    %7 = vector.load %arg4[%c0_5, %c0_6] : memref<256x128xf32, #tpu.memory_space<vmem>>, vector<256x128xf32>
    tpu.vector_store %arg4[%c0_5, %c0_6], %6 {strides = array<i32>} : memref<256x128xf32, #tpu.memory_space<vmem>>, vector<256x128xf32>,
    return
  }
  func.func @transform_0(%arg0: i32) -> (i32, i32) {
    %c0_i32 = arith.constant 0 : i32
    %c0_i32_0 = arith.constant 0 : i32
    return %arg0, %c0_i32 : i32, i32
  }
  func.func @transform_1(%arg0: i32) -> (i32, i32) {
    %c0_i32 = arith.constant 0 : i32
    %c0_i32_0 = arith.constant 0 : i32
    %c0_i32_1 = arith.constant 0 : i32
    return %c0_i32, %c0_i32_0 : i32, i32
  }
  func.func @transform_2(%arg0: i32) -> (i32, i32) {
    %c0_i32 = arith.constant 0 : i32
    %c0_i32_0 = arith.constant 0 : i32
    %c0_i32_1 = arith.constant 0 : i32
    return %c0_i32, %c0_i32_0 : i32, i32
  }
  func.func @transform_3(%arg0: i32) -> (i32, i32) {
    %c0_i32 = arith.constant 0 : i32
    %c0_i32_0 = arith.constant 0 : i32
    return %arg0, %c0_i32 : i32, i32
  }
}

</mosaic_0001>

<bundles_post_ra>
// kernel: generator_forward.10
= control target key start
LH: loop header
LB: loop body
LE: loop exit
PB: predicated region body
PF: predicated region fallthrough
CT: control target
= control target key end

     0   :  { %s326_s12 = smov 0   ;;  %s343_s0 = inlined_call_operand.vmem [shape: bf16[32,128], index: 0, kind: input, shape index: {}]   ;;  %s344_s1 = inlined_call_operand.vmem [shape: f32[1,128], index: 1, kind: input, shape index: {}]   ;;  %s345_s2 = inlined_call_operand.vmem [shape: f32[1,128], index: 2, kind: input, shape index: {}]   ;;  %s346_s3 = inlined_call_operand.vmem [shape: bf16[32,128], index: 3, kind: output, shape index: {}]  }
   0x1 LB: > { %s264_s13 = sadd.s32 4294967295, %s304_s12   ;;  %p268_p0 = scmp.ge.s32.totalorder %s304_s12, 1  ;;  %s304_s12 = sphi %s326_s12, %s13_s12  }
   0x2   : > { %p138_p1 = scmp.lt.s32.totalorder %s304_s12, 3 }
   0x4   : > { %p139_p2 = pnand %p268_p0, %p138_p1 }
   0x5   : > { %s269_s14 = sshll.u32 (!%p139_p2), %s264_s13, 1  ;;  %v273_v1 = vld [vmem:[%s344_s1] ss:$0 sm:$0xff] (!%p139_p2) }
   0x6   : > { %142 = sbr.rel (%p139_p2) target bundleno = 28 (0x1c), region = 32  ;;  %p163_p3 = scmp.lt.s32.totalorder (!%p139_p2), %s269_s14, 3  ;;  %v274_v4 = vld [vmem:[%s345_s2] ss:$0 sm:$0xff] (!%p139_p2) }
   0xd   : > { %s348_s14 = smov (!%p163_p3, %s269_s14), 3 }
   0xe   : > { %s270_s15 = sshll.u32 %s348_s14, 2 }
   0xf   : > { %s166_s18 = scalar_lea.vmem %s343_s0, %s270_s15  ;;  %s172_s25 = scalar_lea.vmem %s346_s3, %s270_s15 }
  0x10   : > { %v282_v0 = vld [vmem:[%s166_s18] sm:$0xff]  }
  0x11   : > { %v283_v2 = vunpack.c.l.bf16 %v282_v0  ;;  %v284_v3 = vunpack.c.h.bf16 %v282_v0 }
  0x13   : > { %v185_v5 = vmul.f32 %v283_v2, %v273_v1  ;;  %v186_v6 = vmul.f32 %v284_v3, %v273_v1 }
  0x15   : > { %v194_v7 = vadd.f32 %v274_v4, %v185_v5  ;;  %v195_v8 = vadd.f32 %v274_v4, %v186_v6 }
  0x17   : > { %v196_v9 = vmax.f32 %v194_v7, 0.0  ;;  %v197_v10 = vmax.f32 %v195_v8, 0.0 }
  0x19   : > { %v288_v11 = vpack.c.bf16 %v197_v10, %v196_v9 }
  0x1b   : > { %289 = vst [vmem:[%s172_s25] sm:$0xff] %v288_v11  }
  0x1c PF: > { %s13_s12 = sadd.s32 1, %s304_s12  }
  0x1d   : > { %p10_p4 = scmp.ge.s32.totalorder %s13_s12, 4  }
  0x1f   :  { %12 = sbr.rel (!%p10_p4) target bundleno = 1 (0x1), region = 62 }

// kernel: generator_forward.9
= control target key start
LH: loop header
LB: loop body
LE: loop exit
PB: predicated region body
PF: predicated region fallthrough
CT: control target
= control target key end

     0   :  { %7 = vsyncpa [#allocation3], 0  ;;  %s817_s9 = smov [#allocation2]   ;;  %s941_s0 = inlined_call_operand.vmem [shape: bf16[16,24], index: 0, kind: input, shape index: {}]   ;;  %s942_s1 = inlined_call_operand.hbm [shape: bf16[24,2048], index: 1, kind: input, shape index: {}]   ;;  %s943_s2 = inlined_call_operand.vmem [shape: bf16[16,2048], index: 2, kind: output, shape index: {}]  }
   0x1   :  { %s15_s10 = sshll.u32 %s817_s9, 4  ;;  %s793_s13 = scalar_lea.hbm %s942_s1, 3072  ;;  %s16_s10 = int_to_ptr.vmem [resolvable:$true] %s15_s10 }
   0x2   :  { %p794_p0 = scmp.ne.s32.totalorder %s942_s1, %s793_s13  ;;  %p797_p1 = scmp.lt.u32.totalorder %s793_s13, %s942_s1 }
   0x4   :  { %p799_p2 = pnand %p797_p1, %p794_p0 }
   0x6   :  { %802 = shalt.err (!%p799_p2)
}
   0x7   :  { %s803_s18 = scalar_lea.vmem %s16_s10, 3072  ;;  %p808_p4 = scmp.lt.s32.totalorder %s16_s10, %s16_s10 }
   0x8   :  { %p804_p3 = scmp.ne.s32.totalorder %s16_s10, %s803_s18  ;;  %p809_p5 = scmp.lt.s32.totalorder %s803_s18, %s803_s18 }
   0xa   :  { %p810_p6 = por %p809_p5, %p808_p4 }
   0xc   :  { %p811_p7 = pnand %p810_p6, %p804_p3 }
   0xe   :  { %814 = shalt.err (!%p811_p7)
}
   0xf   :  { %s818_s19 = smov 1024   ;;  %s819_s20 = smov 64  }
  0x10   :  { %21 = dma.hbm_to_vmem [thread:$0]  %s942_s1, 3072, %s16_s10, [#allocation3], %s818_s19, %s818_s19, %s819_s20  }
  0x11   :  { %815 = dma.done.wait [#allocation3], 3072  }
  0x12   :  { %816 = vsyncadd [#allocation3], 4294964224  ;;  %v820_v0 = vmov 0   ;;  %v28_v1 = vld [vmem:[#allocation2] sm:$0xff]  ;;  %v29_v3 = vld [vmem:[#allocation2 + $0x8] sm:$0xff]  ;;  %vm181_vm0 = vcmask 1043456  }
  0x13   :  { %262 = vmatprep.mubr.bf16.mxu0 %v820_v0  ;;  %305 = vmatprep.mubr.bf16.mxu1 %v820_v0  ;;  %v36_v2 = vld [vmem:[#allocation2 + $0x40] sm:$0xff]  ;;  %v37_v5 = vld [vmem:[#allocation2 + $0x48] sm:$0xff]  ;;  %v30_v15 = vld [vmem:[#allocation2 + $0x10] sm:$0xff]  ;;  %vm177_vm1 = vcmask 195584  }
  0x14   :  { %v693_v4 = vcombine.high %v28_v1, %v36_v2  ;;  %v692_v6 = vcombine.low %v28_v1, %v36_v2  ;;  %v44_v7 = vld [vmem:[#allocation2 + $0x80] sm:$0xff]  ;;  %v45_v8 = vld [vmem:[#allocation2 + $0x88] sm:$0xff]  ;;  %v695_v9 = vcombine.high %v29_v3, %v37_v5  ;;  %v694_v10 = vcombine.low %v29_v3, %v37_v5  ;;  %v38_v16 = vld [vmem:[#allocation2 + $0x50] sm:$0xff] }
  0x15   :  { %v709_v11 = vcombine.high %v44_v7, %v44_v7  ;;  %v711_v12 = vcombine.high %v45_v8, %v45_v8  ;;  %v708_v13 = vcombine.low %v44_v7, %v44_v7  ;;  %v710_v14 = vcombine.low %v45_v8, %v45_v8  ;;  %v31_v17 = vld [vmem:[#allocation2 + $0x18] sm:$0xff]  ;;  %v46_v23 = vld [vmem:[#allocation2 + $0x90] sm:$0xff]  ;;  %v857_v24 = vld [vmem:[%s941_s0] sm:$0xff]  }
  0x16   :  { %230 = vmatprep.subr.bf16.mxu0 %v693_v4  ;;  %273 = vmatprep.subr.bf16.mxu1 %v695_v9  ;;  %v39_v18 = vld [vmem:[#allocation2 + $0x58] sm:$0xff]  ;;  %v697_v20 = vcombine.high %v30_v15, %v38_v16  ;;  %v696_v26 = vcombine.low %v30_v15, %v38_v16  ;;  %v713_v28 = vcombine.high %v46_v23, %v46_v23  ;;  %v32_v32 = vld [vmem:[#allocation2 + $0x20] sm:$0xff]  ;;  %v33_v34 = vld [vmem:[#allocation2 + $0x28] sm:$0xff] }
  0x17   :  { %231 = vmatpush1.bf16.msra.mxu0 %v692_v6  ;;  %274 = vmatpush1.bf16.msra.mxu1 %v694_v10  ;;  %v183_v19 = vsel %vm181_vm0, %v708_v13, 0  ;;  %v189_v21 = vsel %vm181_vm0, %v710_v14, 0  ;;  %v699_v22 = vcombine.high %v31_v17, %v39_v18  ;;  %v47_v25 = vld [vmem:[#allocation2 + $0x98] sm:$0xff]  ;;  %v698_v27 = vcombine.low %v31_v17, %v39_v18  ;;  %v40_v33 = vld [vmem:[#allocation2 + $0x60] sm:$0xff]  ;;  %v41_v35 = vld [vmem:[#allocation2 + $0x68] sm:$0xff] }
  0x18   :  { %724 = vmatprep.subr.msk.bf16.mxu0 %vm181_vm0, %v709_v11  ;;  %726 = vmatprep.subr.msk.bf16.mxu1 %vm181_vm0, %v711_v12  ;;  %v712_v29 = vcombine.low %v46_v23, %v46_v23  ;;  %v715_v30 = vcombine.high %v47_v25, %v47_v25  ;;  %v714_v31 = vcombine.low %v47_v25, %v47_v25  ;;  %v48_v40 = vld [vmem:[#allocation2 + $0xa0] sm:$0xff]  ;;  %v49_v41 = vld [vmem:[#allocation2 + $0xa8] sm:$0xff]  ;;  %v34_v48 = vld [vmem:[#allocation2 + $0x30] sm:$0xff] }
  0x19   :  { %v701_v37 = vcombine.high %v32_v32, %v40_v33  ;;  %v703_v39 = vcombine.high %v33_v34, %v41_v35  ;;  %v700_v42 = vcombine.low %v32_v32, %v40_v33  ;;  %v702_v43 = vcombine.low %v33_v34, %v41_v35  ;;  %v42_v49 = vld [vmem:[#allocation2 + $0x70] sm:$0xff]  ;;  %v35_v50 = vld [vmem:[#allocation2 + $0x38] sm:$0xff] }
  0x1a   :  { %v195_v36 = vsel %vm181_vm0, %v712_v29, 0  ;;  %v201_v38 = vsel %vm181_vm0, %v714_v31, 0  ;;  %v717_v44 = vcombine.high %v48_v40, %v48_v40  ;;  %v716_v45 = vcombine.low %v48_v40, %v48_v40  ;;  %v43_v51 = vld [vmem:[#allocation2 + $0x78] sm:$0xff]  ;;  %v50_v56 = vld [vmem:[#allocation2 + $0xb0] sm:$0xff] }
  0x1b   :  { %233 = vmatpush1.bf16.msra.mxu0 %v183_v19  ;;  %276 = vmatpush1.bf16.msra.mxu1 %v189_v21  ;;  %v719_v46 = vcombine.high %v49_v41, %v49_v41  ;;  %v718_v47 = vcombine.low %v49_v41, %v49_v41  ;;  %v705_v53 = vcombine.high %v34_v48, %v42_v49  ;;  %v51_v57 = vld [vmem:[#allocation2 + $0xb8] sm:$0xff] }
  0x1c   :  { %316 = vmatprep.subr.bf16.mxu0 %v697_v20  ;;  %359 = vmatprep.subr.bf16.mxu1 %v699_v22  ;;  %v207_v52 = vsel %vm181_vm0, %v716_v45, 0  ;;  %v707_v55 = vcombine.high %v35_v50, %v43_v51  ;;  %v704_v58 = vcombine.low %v34_v48, %v42_v49  ;;  %v706_v59 = vcombine.low %v35_v50, %v43_v51 }
  0x1d   :  { %v213_v54 = vsel %vm181_vm0, %v718_v47, 0  ;;  %v721_v60 = vcombine.high %v50_v56, %v50_v56  ;;  %v720_v61 = vcombine.low %v50_v56, %v50_v56  ;;  %v723_v62 = vcombine.high %v51_v57, %v51_v57 }
  0x1e   :  { %725 = vmatmul.mubr.msk.bf16.vlgmr.msra.gmra.mrb[0].mxu0 %vm177_vm1, %v857_v24  ;;  %727 = vmatmul.mubr.msk.bf16.vlgmr.msra.gmra.mrb[0].mxu1 %vm177_vm1, %v857_v24  ;;  %v722_v63 = vcombine.low %v51_v57, %v51_v57 }
  0x1f   :  { %317 = vmatpush1.bf16.msra.mxu0 %v696_v26  ;;  %360 = vmatpush1.bf16.msra.mxu1 %v698_v27  ;;  %v219_v1 = vsel %vm181_vm0, %v720_v61, 0 }
  0x20   :  { %728 = vmatprep.subr.msk.bf16.mxu0 %vm181_vm0, %v713_v28  ;;  %730 = vmatprep.subr.msk.bf16.mxu1 %vm181_vm0, %v715_v30  ;;  %v225_v2 = vsel %vm181_vm0, %v722_v63, 0 }
  0x21   :  { %348 = vmatprep.mubr.bf16.mxu0 %v820_v0  ;;  %391 = vmatprep.mubr.bf16.mxu1 %v820_v0 }
  0x23   :  { %319 = vmatpush1.bf16.msra.mxu0 %v195_v36  ;;  %362 = vmatpush1.bf16.msra.mxu1 %v201_v38 }
  0x24   :  { %402 = vmatprep.subr.bf16.mxu0 %v701_v37  ;;  %445 = vmatprep.subr.bf16.mxu1 %v703_v39 }
  0x26   :  { %729 = vmatmul.mubr.msk.bf16.vlgmr.msra.gmra.mrb[4].mxu0 %vm177_vm1, %v857_v24  ;;  %731 = vmatmul.mubr.msk.bf16.vlgmr.msra.gmra.mrb[4].mxu1 %vm177_vm1, %v857_v24 }
  0x27   :  { %403 = vmatpush1.bf16.msra.mxu0 %v700_v42  ;;  %446 = vmatpush1.bf16.msra.mxu1 %v702_v43 }
  0x28   :  { %732 = vmatprep.subr.msk.bf16.mxu0 %vm181_vm0, %v717_v44  ;;  %734 = vmatprep.subr.msk.bf16.mxu1 %vm181_vm0, %v719_v46 }
  0x29   :  { %434 = vmatprep.mubr.bf16.mxu0 %v820_v0  ;;  %477 = vmatprep.mubr.bf16.mxu1 %v820_v0 }
  0x2b   :  { %405 = vmatpush1.bf16.msra.mxu0 %v207_v52  ;;  %448 = vmatpush1.bf16.msra.mxu1 %v213_v54 }
  0x2c   :  { %488 = vmatprep.subr.bf16.mxu0 %v705_v53  ;;  %531 = vmatprep.subr.bf16.mxu1 %v707_v55 }
  0x2e   :  { %733 = vmatmul.mubr.msk.bf16.vlgmr.msra.gmra.mrb[8].mxu0 %vm177_vm1, %v857_v24  ;;  %735 = vmatmul.mubr.msk.bf16.vlgmr.msra.gmra.mrb[8].mxu1 %vm177_vm1, %v857_v24 }
  0x2f   :  { %489 = vmatpush1.bf16.msra.mxu0 %v704_v58  ;;  %532 = vmatpush1.bf16.msra.mxu1 %v706_v59 }
  0x30   :  { %736 = vmatprep.subr.msk.bf16.mxu0 %vm181_vm0, %v721_v60  ;;  %738 = vmatprep.subr.msk.bf16.mxu1 %vm181_vm0, %v723_v62 }
  0x31   :  { %520 = vmatprep.mubr.bf16.mxu0 %v820_v0  ;;  %563 = vmatprep.mubr.bf16.mxu1 %v820_v0 }
  0x33   :  { %491 = vmatpush1.bf16.msra.mxu0 %v219_v1  ;;  %534 = vmatpush1.bf16.msra.mxu1 %v225_v2 }
  0x36   :  { %737 = vmatmul.mubr.msk.bf16.vlgmr.msra.gmra.mrb[12].mxu0 %vm177_vm1, %v857_v24  ;;  %739 = vmatmul.mubr.msk.bf16.vlgmr.msra.gmra.mrb[12].mxu1 %vm177_vm1, %v857_v24 }
  0xf1   :  { %v264_v3 = vpop.f32.mrb[0].mxu0  ;;  %v307_v4 = vpop.f32.mrb[0].mxu1 }
  0xf2   :  { %v266_v5 = vpop.f32.mrb[1].mxu0  ;;  %v309_v7 = vpop.f32.mrb[1].mxu1 }
  0xf3   :  { %v756_v6 = vpack.c.bf16 %v266_v5, %v264_v3  ;;  %v268_v8 = vpop.f32.mrb[2].mxu0  ;;  %v757_v9 = vpack.c.bf16 %v309_v7, %v307_v4  ;;  %v311_v10 = vpop.f32.mrb[2].mxu1 }
  0xf4   :  { %v270_v11 = vpop.f32.mrb[3].mxu0  ;;  %v313_v12 = vpop.f32.mrb[3].mxu1 }
  0xf5   :  { %670 = vst [vmem:[%s943_s2] sm:$0xff] %v756_v6  ;;  %v764_v0 = vpack.c.bf16 %v270_v11, %v268_v8  ;;  %671 = vst [vmem:[%s943_s2 + $0x8] sm:$0xff] %v757_v9  ;;  %v765_v13 = vpack.c.bf16 %v313_v12, %v311_v10 }
  0xf7   :  { %678 = vst [vmem:[%s943_s2 + $0x40] sm:$0xff] %v764_v0  ;;  %679 = vst [vmem:[%s943_s2 + $0x48] sm:$0xff] %v765_v13 }
  0xf9   :  { %v350_v14 = vpop.f32.mrb[4].mxu0  ;;  %v393_v15 = vpop.f32.mrb[4].mxu1 }
  0xfa   :  { %v352_v16 = vpop.f32.mrb[5].mxu0  ;;  %v395_v18 = vpop.f32.mrb[5].mxu1 }
  0xfb   :  { %v758_v17 = vpack.c.bf16 %v352_v16, %v350_v14  ;;  %v354_v19 = vpop.f32.mrb[6].mxu0  ;;  %v759_v20 = vpack.c.bf16 %v395_v18, %v393_v15  ;;  %v397_v21 = vpop.f32.mrb[6].mxu1 }
  0xfc   :  { %v356_v22 = vpop.f32.mrb[7].mxu0  ;;  %v399_v24 = vpop.f32.mrb[7].mxu1 }
  0xfd   :  { %672 = vst [vmem:[%s943_s2 + $0x10] sm:$0xff] %v758_v17  ;;  %v766_v23 = vpack.c.bf16 %v356_v22, %v354_v19  ;;  %673 = vst [vmem:[%s943_s2 + $0x18] sm:$0xff] %v759_v20  ;;  %v767_v25 = vpack.c.bf16 %v399_v24, %v397_v21 }
  0xff   :  { %680 = vst [vmem:[%s943_s2 + $0x50] sm:$0xff] %v766_v23  ;;  %681 = vst [vmem:[%s943_s2 + $0x58] sm:$0xff] %v767_v25 }
 0x101   :  { %v436_v26 = vpop.f32.mrb[8].mxu0  ;;  %v479_v27 = vpop.f32.mrb[8].mxu1 }
 0x102   :  { %v438_v28 = vpop.f32.mrb[9].mxu0  ;;  %v481_v30 = vpop.f32.mrb[9].mxu1 }
 0x103   :  { %v760_v29 = vpack.c.bf16 %v438_v28, %v436_v26  ;;  %v440_v31 = vpop.f32.mrb[10].mxu0  ;;  %v761_v32 = vpack.c.bf16 %v481_v30, %v479_v27  ;;  %v483_v33 = vpop.f32.mrb[10].mxu1 }
 0x104   :  { %v442_v34 = vpop.f32.mrb[11].mxu0  ;;  %v485_v36 = vpop.f32.mrb[11].mxu1 }
 0x105   :  { %674 = vst [vmem:[%s943_s2 + $0x20] sm:$0xff] %v760_v29  ;;  %v768_v35 = vpack.c.bf16 %v442_v34, %v440_v31  ;;  %675 = vst [vmem:[%s943_s2 + $0x28] sm:$0xff] %v761_v32  ;;  %v769_v37 = vpack.c.bf16 %v485_v36, %v483_v33 }
 0x107   :  { %682 = vst [vmem:[%s943_s2 + $0x60] sm:$0xff] %v768_v35  ;;  %683 = vst [vmem:[%s943_s2 + $0x68] sm:$0xff] %v769_v37 }
 0x109   :  { %v522_v38 = vpop.f32.mrb[12].mxu0  ;;  %v565_v39 = vpop.f32.mrb[12].mxu1 }
 0x10a   :  { %v524_v40 = vpop.f32.mrb[13].mxu0  ;;  %v567_v42 = vpop.f32.mrb[13].mxu1 }
 0x10b   :  { %v762_v41 = vpack.c.bf16 %v524_v40, %v522_v38  ;;  %v526_v43 = vpop.f32.mrb[14].mxu0  ;;  %v763_v44 = vpack.c.bf16 %v567_v42, %v565_v39  ;;  %v569_v45 = vpop.f32.mrb[14].mxu1 }
 0x10c   :  { %v528_v46 = vpop.f32.mrb[15].mxu0  ;;  %v571_v48 = vpop.f32.mrb[15].mxu1 }
 0x10d   :  { %676 = vst [vmem:[%s943_s2 + $0x30] sm:$0xff] %v762_v41  ;;  %v770_v47 = vpack.c.bf16 %v528_v46, %v526_v43  ;;  %677 = vst [vmem:[%s943_s2 + $0x38] sm:$0xff] %v763_v44  ;;  %v771_v49 = vpack.c.bf16 %v571_v48, %v569_v45 }
 0x10f   :  { %684 = vst [vmem:[%s943_s2 + $0x70] sm:$0xff] %v770_v47  ;;  %685 = vst [vmem:[%s943_s2 + $0x78] sm:$0xff] %v771_v49 }
 0x110   :  { %690 = vsyncpa [#allocation3], 1 }

// kernel: generator_forward.11
= control target key start
LH: loop header
LB: loop body
LE: loop exit
PB: predicated region body
PF: predicated region fallthrough
CT: control target
= control target key end

     0   :  { %7 = vsyncpa [#allocation3], 0  ;;  %s1019_s9 = smov 0   ;;  %s1088_s0 = inlined_call_operand.vmem [shape: bf16[64,512], index: 0, kind: input, shape index: {}]   ;;  %s1089_s1 = inlined_call_operand.hbm [shape: bf16[512,256], index: 1, kind: input, shape index: {}]   ;;  %s1090_s2 = inlined_call_operand.vmem [shape: bf16[64,256], index: 2, kind: output, shape index: {}]  }
   0x1 LB: > { %s745_s10 = sadd.s32 4294967295, %s999_s9   ;;  %p747_p0 = scmp.ge.s32.totalorder %s999_s9, 1  ;;  %s999_s9 = sphi %s1019_s9, %s13_s9  }
   0x2   : > { %p91_p1 = scmp.lt.s32.totalorder %s999_s9, 5  ;;  %s1001_s11 = smov [#allocation2]  }
   0x3   : > { %s103_s12 = sshll.u32 %s1001_s11, 4  ;;  %p1033_p3 = scmp.eq.s32.totalorder %s745_s10, 0  ;;  %s104_s12 = int_to_ptr.vmem [resolvable:$true] %s103_s12 }
   0x4   : > { %p1027_p2 = pnand %p747_p0, %p91_p1  ;;  %s961_s18 = scalar_lea.hbm %s1089_s1, 8192 }
   0x5   : > { %s1095_s14 = scalar_select %p1033_p3, 1, 0 }
   0x6   : > { %s1094_s13 = scalar_select %p1027_p2, 1, 0 }
   0x7   : > { %p842_p4 = pneg %p1027_p2  ;;  %p962_p6 = scmp.ne.s32.totalorder %s1089_s1, %s961_s18 }
   0x8   : > { %p968_p10 = scmp.lt.u32.totalorder %s961_s18, %s1089_s1 }
   0x9   : > { %p1041_p5 = pnand %p1033_p3, %p842_p4 }
   0xb   : > { %p963_p7 = pneg %p1041_p5 }
   0xd   : > { %p964_p8 = pnand %p963_p7, %p962_p6 }
   0xf   : > { %p965_p9 = pneg %p964_p8 }
  0x11   : > { %p970_p11 = pnand %p968_p10, %p965_p9 }
  0x13   : > { %973 = shalt.err (!%p970_p11)
}
  0x14   : > { %s974_s23 = scalar_lea.vmem %s104_s12, 8192  ;;  %p982_p1 = scmp.lt.s32.totalorder %s104_s12, %s104_s12 }
  0x15   : > { %p975_p12 = scmp.ne.s32.totalorder %s104_s12, %s974_s23  ;;  %p983_p4 = scmp.lt.s32.totalorder %s974_s23, %s974_s23 }
  0x17   : > { %p977_p13 = pnand %p975_p12, %p963_p7  ;;  %p984_p3 = por %p983_p4, %p982_p1 }
  0x19   : > { %p978_p0 = pneg %p977_p13 }
  0x1b   : > { %p985_p2 = pnand %p984_p3, %p978_p0 }
  0x1d   : > { %988 = shalt.err (!%p985_p2)
}
  0x1e   : > { %s1002_s24 = smov 128   ;;  %s1003_s25 = smov 8  }
  0x1f   : > { %845 = dma.hbm_to_vmem [thread:$0]  (!%p1041_p5), %s1089_s1, 8192, %s104_s12, [#allocation3], %s1002_s24, %s1002_s24, %s1003_s25  }
  0x20   : > { %p1097_p6 = scmp.ne.s32.totalorder %s1094_s13, 0 }
  0x21   : > { %p1098_p8 = scmp.ne.s32.totalorder (!%p1097_p6), %s1095_s14, 0 }
  0x22   : > { %129 = sbr.rel (%p1097_p6) target bundleno = 328 (0x148), region = 28 }
  0x29   : > { %994 = dma.done.wait (%p1098_p8), [#allocation3], 8192  }
  0x2a   : > { %996 = vsyncadd (%p1098_p8), [#allocation3], 4294959104  ;;  %v859_v0 = vld [vmem:[#allocation2 + $0x4] ss:$8 sps:$4 sm:$0xff]   ;;  %v863_v2 = vld [vmem:[#allocation2] ss:$8 sps:$4 sm:$0xff]  }
  0x2b   : > { %v861_v1 = vld [vmem:[#allocation2 + $0x104] ss:$8 sps:$4 sm:$0xff]   ;;  %575 = vmatprep.subr.bf16.mxu1 %v859_v0  ;;  %v864_v3 = vld [vmem:[#allocation2 + $0x100] ss:$8 sps:$4 sm:$0xff]   ;;  %v865_v4 = vld [vmem:[#allocation2 + $0x14] ss:$8 sps:$4 sm:$0xff]  }
  0x2c   : > { %618 = vmatprep.subr.bf16.mxu0 %v861_v1  ;;  %576 = vmatpush1.bf16.msra.mxu1 %v863_v2  ;;  %v867_v5 = vld [vmem:[#allocation2 + $0x114] ss:$8 sps:$4 sm:$0xff]   ;;  %v869_v6 = vld [vmem:[#allocation2 + $0x10] ss:$8 sps:$4 sm:$0xff]   ;;  %v871_v8 = vld [vmem:[#allocation2 + $0x24] ss:$8 sps:$4 sm:$0xff]  }
  0x2d   : > { %619 = vmatpush1.bf16.msra.mxu0 %v864_v3  ;;  %577 = vmatprep.subr.bf16.mxu1 %v865_v4  ;;  %v870_v7 = vld [vmem:[#allocation2 + $0x110] ss:$8 sps:$4 sm:$0xff]   ;;  %v873_v9 = vld [vmem:[#allocation2 + $0x124] ss:$8 sps:$4 sm:$0xff]   ;;  %v875_v10 = vld [vmem:[#allocation2 + $0x20] ss:$8 sps:$4 sm:$0xff]  }
  0x2e   : > { %620 = vmatprep.subr.bf16.mxu0 %v867_v5  ;;  %v876_v11 = vld [vmem:[#allocation2 + $0x120] ss:$8 sps:$4 sm:$0xff]   ;;  %v877_v12 = vld [vmem:[#allocation2 + $0x34] ss:$8 sps:$4 sm:$0xff]   ;;  %v881_v14 = vld [vmem:[#allocation2 + $0x30] ss:$8 sps:$4 sm:$0xff]  }
  0x2f   : > { %v879_v13 = vld [vmem:[#allocation2 + $0x134] ss:$8 sps:$4 sm:$0xff]   ;;  %v882_v15 = vld [vmem:[#allocation2 + $0x130] ss:$8 sps:$4 sm:$0xff]   ;;  %v883_v16 = vld [vmem:[#allocation2 + $0x44] ss:$8 sps:$4 sm:$0xff]  }
  0x30   : > { %578 = vmatpush1.bf16.msra.mxu1 %v869_v6  ;;  %v885_v17 = vld [vmem:[#allocation2 + $0x144] ss:$8 sps:$4 sm:$0xff]   ;;  %v887_v18 = vld [vmem:[#allocation2 + $0x40] ss:$8 sps:$4 sm:$0xff]   ;;  %v889_v20 = vld [vmem:[#allocation2 + $0x54] ss:$8 sps:$4 sm:$0xff]  }
  0x31   : > { %621 = vmatpush1.bf16.msra.mxu0 %v870_v7  ;;  %579 = vmatprep.subr.bf16.mxu1 %v871_v8  ;;  %v888_v19 = vld [vmem:[#allocation2 + $0x140] ss:$8 sps:$4 sm:$0xff]   ;;  %v891_v21 = vld [vmem:[#allocation2 + $0x154] ss:$8 sps:$4 sm:$0xff]   ;;  %v893_v22 = vld [vmem:[#allocation2 + $0x50] ss:$8 sps:$4 sm:$0xff]  }
  0x32   : > { %622 = vmatprep.subr.bf16.mxu0 %v873_v9  ;;  %v894_v23 = vld [vmem:[#allocation2 + $0x150] ss:$8 sps:$4 sm:$0xff]   ;;  %v895_v24 = vld [vmem:[#allocation2 + $0x64] ss:$8 sps:$4 sm:$0xff]   ;;  %v899_v26 = vld [vmem:[#allocation2 + $0x60] ss:$8 sps:$4 sm:$0xff]  }
  0x33   : > { %v897_v25 = vld [vmem:[#allocation2 + $0x164] ss:$8 sps:$4 sm:$0xff]   ;;  %v900_v27 = vld [vmem:[#allocation2 + $0x160] ss:$8 sps:$4 sm:$0xff]   ;;  %v901_v28 = vld [vmem:[#allocation2 + $0x74] ss:$8 sps:$4 sm:$0xff]  }
  0x34   : > { %580 = vmatpush1.bf16.msra.mxu1 %v875_v10  ;;  %v903_v29 = vld [vmem:[#allocation2 + $0x174] ss:$8 sps:$4 sm:$0xff]   ;;  %s752_s28 = sshll.u32 %s745_s10, 1  ;;  %v905_v30 = vld [vmem:[#allocation2 + $0x70] ss:$8 sps:$4 sm:$0xff]  }
  0x35   : > { %623 = vmatpush1.bf16.msra.mxu0 %v876_v11  ;;  %581 = vmatprep.subr.bf16.mxu1 %v877_v12  ;;  %v906_v31 = vld [vmem:[#allocation2 + $0x170] ss:$8 sps:$4 sm:$0xff]   ;;  %v907_v32 = vld [vmem:[#allocation2 + $0x84] ss:$8 sps:$4 sm:$0xff]   ;;  %p154_p2 = scmp.lt.s32.totalorder %s752_s28, 7 }
  0x36   : > { %624 = vmatprep.subr.bf16.mxu0 %v879_v13  ;;  %v909_v33 = vld [vmem:[#allocation2 + $0x184] ss:$8 sps:$4 sm:$0xff]   ;;  %v911_v34 = vld [vmem:[#allocation2 + $0x80] ss:$8 sps:$4 sm:$0xff]   ;;  %v913_v36 = vld [vmem:[#allocation2 + $0x94] ss:$8 sps:$4 sm:$0xff]  }
  0x37   : > { %v912_v35 = vld [vmem:[#allocation2 + $0x180] ss:$8 sps:$4 sm:$0xff]   ;;  %v915_v37 = vld [vmem:[#allocation2 + $0x194] ss:$8 sps:$4 sm:$0xff]   ;;  %s1100_s28 = smov (!%p154_p2, %s752_s28), 7 }
  0x38   : > { %582 = vmatpush1.bf16.msra.mxu1 %v881_v14  ;;  %v917_v38 = vld [vmem:[#allocation2 + $0x90] ss:$8 sps:$4 sm:$0xff]   ;;  %v919_v40 = vld [vmem:[#allocation2 + $0xa4] ss:$8 sps:$4 sm:$0xff]   ;;  %s830_s29 = sshll.u32 %s1100_s28, 4  ;;  %s831_s5 = sshll.u32 %s1100_s28, 3 }
  0x39   : > { %625 = vmatpush1.bf16.msra.mxu0 %v882_v15  ;;  %583 = vmatprep.subr.bf16.mxu1 %v883_v16  ;;  %v918_v39 = vld [vmem:[#allocation2 + $0x190] ss:$8 sps:$4 sm:$0xff]   ;;  %v921_v41 = vld [vmem:[#allocation2 + $0x1a4] ss:$8 sps:$4 sm:$0xff]   ;;  %v923_v42 = vld [vmem:[#allocation2 + $0xa0] ss:$8 sps:$4 sm:$0xff]   ;;  %s1075_s4 = scalar_lea.vmem %s1088_s0, %s830_s29  ;;  %s165_s8 = scalar_lea.vmem %s1090_s2, %s831_s5 }
  0x3a   : > { %626 = vmatprep.subr.bf16.mxu0 %v885_v17  ;;  %v924_v43 = vld [vmem:[#allocation2 + $0x1a0] ss:$8 sps:$4 sm:$0xff]   ;;  %v925_v44 = vld [vmem:[#allocation2 + $0xb4] ss:$8 sps:$4 sm:$0xff]   ;;  %v929_v46 = vld [vmem:[#allocation2 + $0xb0] ss:$8 sps:$4 sm:$0xff]  }
  0x3b   : > { %v927_v45 = vld [vmem:[#allocation2 + $0x1b4] ss:$8 sps:$4 sm:$0xff]   ;;  %v930_v48 = vld [vmem:[#allocation2 + $0x1b0] ss:$8 sps:$4 sm:$0xff]   ;;  %v931_v49 = vld [vmem:[#allocation2 + $0xc4] ss:$8 sps:$4 sm:$0xff]  }
  0x3c   : > { %584 = vmatpush1.bf16.msra.mxu1 %v887_v18  ;;  %v957_v47 = vld [vmem:[%s1075_s4 + $0x4] ss:$16 sps:$4 sm:$0xff]   ;;  %v960_v51 = vld [vmem:[%s1075_s4 + $0xc] ss:$16 sps:$4 sm:$0xff]   ;;  %v935_v52 = vld [vmem:[#allocation2 + $0xc0] ss:$8 sps:$4 sm:$0xff]  }
  0x3d   : > { %627 = vmatpush1.bf16.msra.mxu0 %v888_v19  ;;  %585 = vmatprep.subr.bf16.mxu1 %v889_v20  ;;  %v933_v50 = vld [vmem:[#allocation2 + $0x1c4] ss:$8 sps:$4 sm:$0xff]   ;;  %v936_v53 = vld [vmem:[#allocation2 + $0x1c0] ss:$8 sps:$4 sm:$0xff]   ;;  %v937_v54 = vld [vmem:[#allocation2 + $0xd4] ss:$8 sps:$4 sm:$0xff]  }
  0x3e   : > { %628 = vmatprep.subr.bf16.mxu0 %v891_v21  ;;  %607 = vmatprep.mubr.bf16.mxu1 %v957_v47  ;;  %v939_v55 = vld [vmem:[#allocation2 + $0x1d4] ss:$8 sps:$4 sm:$0xff]   ;;  %v941_v56 = vld [vmem:[#allocation2 + $0xd0] ss:$8 sps:$4 sm:$0xff]   ;;  %v943_v58 = vld [vmem:[#allocation2 + $0xe4] ss:$8 sps:$4 sm:$0xff]  }
  0x3f   : > { %650 = vmatprep.mubr.bf16.mxu0 %v960_v51  ;;  %v942_v57 = vld [vmem:[#allocation2 + $0x1d0] ss:$8 sps:$4 sm:$0xff]   ;;  %v945_v59 = vld [vmem:[#allocation2 + $0x1e4] ss:$8 sps:$4 sm:$0xff]   ;;  %v947_v60 = vld [vmem:[#allocation2 + $0xe0] ss:$8 sps:$4 sm:$0xff]  }
  0x40   : > { %586 = vmatpush1.bf16.msra.mxu1 %v893_v22  ;;  %v948_v61 = vld [vmem:[#allocation2 + $0x1e0] ss:$8 sps:$4 sm:$0xff]   ;;  %v949_v62 = vld [vmem:[#allocation2 + $0xf4] ss:$8 sps:$4 sm:$0xff]   ;;  %v953_v0 = vld [vmem:[#allocation2 + $0xf0] ss:$8 sps:$4 sm:$0xff]  }
  0x41   : > { %629 = vmatpush1.bf16.msra.mxu0 %v894_v23  ;;  %587 = vmatprep.subr.bf16.mxu1 %v895_v24  ;;  %v951_v63 = vld [vmem:[#allocation2 + $0x1f4] ss:$8 sps:$4 sm:$0xff]   ;;  %v954_v1 = vld [vmem:[#allocation2 + $0x1f0] ss:$8 sps:$4 sm:$0xff]  }
  0x42   : > { %630 = vmatprep.subr.bf16.mxu0 %v897_v25  ;;  %v955_v2 = vld [vmem:[%s1075_s4] ss:$16 sps:$4 sm:$0xff]   ;;  %v958_v3 = vld [vmem:[%s1075_s4 + $0x8] ss:$16 sps:$4 sm:$0xff]  }
  0x44   : > { %588 = vmatpush1.bf16.msra.mxu1 %v899_v26 }
  0x45   : > { %631 = vmatpush1.bf16.msra.mxu0 %v900_v27  ;;  %589 = vmatprep.subr.bf16.mxu1 %v901_v28 }
  0x46   : > { %632 = vmatprep.subr.bf16.mxu0 %v903_v29 }
  0x48   : > { %590 = vmatpush1.bf16.msra.mxu1 %v905_v30 }
  0x49   : > { %633 = vmatpush1.bf16.msra.mxu0 %v906_v31  ;;  %591 = vmatprep.subr.bf16.mxu1 %v907_v32 }
  0x4a   : > { %634 = vmatprep.subr.bf16.mxu0 %v909_v33 }
  0x4c   : > { %592 = vmatpush1.bf16.msra.mxu1 %v911_v34 }
  0x4d   : > { %635 = vmatpush1.bf16.msra.mxu0 %v912_v35  ;;  %593 = vmatprep.subr.bf16.mxu1 %v913_v36 }
  0x4e   : > { %636 = vmatprep.subr.bf16.mxu0 %v915_v37 }
  0x50   : > { %594 = vmatpush1.bf16.msra.mxu1 %v917_v38 }
  0x51   : > { %637 = vmatpush1.bf16.msra.mxu0 %v918_v39  ;;  %595 = vmatprep.subr.bf16.mxu1 %v919_v40 }
  0x52   : > { %638 = vmatprep.subr.bf16.mxu0 %v921_v41 }
  0x54   : > { %596 = vmatpush1.bf16.msra.mxu1 %v923_v42 }
  0x55   : > { %639 = vmatpush1.bf16.msra.mxu0 %v924_v43  ;;  %597 = vmatprep.subr.bf16.mxu1 %v925_v44 }
  0x56   : > { %640 = vmatprep.subr.bf16.mxu0 %v927_v45 }
  0x58   : > { %598 = vmatpush1.bf16.msra.mxu1 %v929_v46 }
  0x59   : > { %641 = vmatpush1.bf16.msra.mxu0 %v930_v48  ;;  %599 = vmatprep.subr.bf16.mxu1 %v931_v49 }
  0x5a   : > { %642 = vmatprep.subr.bf16.mxu0 %v933_v50 }
  0x5c   : > { %600 = vmatpush1.bf16.msra.mxu1 %v935_v52 }
  0x5d   : > { %643 = vmatpush1.bf16.msra.mxu0 %v936_v53  ;;  %601 = vmatprep.subr.bf16.mxu1 %v937_v54 }
  0x5e   : > { %644 = vmatprep.subr.bf16.mxu0 %v939_v55 }
  0x60   : > { %602 = vmatpush1.bf16.msra.mxu1 %v941_v56 }
  0x61   : > { %645 = vmatpush1.bf16.msra.mxu0 %v942_v57  ;;  %603 = vmatprep.subr.bf16.mxu1 %v943_v58 }
  0x62   : > { %646 = vmatprep.subr.bf16.mxu0 %v945_v59 }
  0x64   : > { %604 = vmatpush1.bf16.msra.mxu1 %v947_v60 }
  0x65   : > { %647 = vmatpush1.bf16.msra.mxu0 %v948_v61  ;;  %605 = vmatprep.subr.bf16.mxu1 %v949_v62 }
  0x66   : > { %648 = vmatprep.subr.bf16.mxu0 %v951_v63 }
  0x68   : > { %606 = vmatpush1.bf16.msra.mxu1 %v953_v0 }
  0x69   : > { %649 = vmatpush1.bf16.msra.mxu0 %v954_v1 }
  0x6b   : > { %608 = vmatmul.mubr.bf16.vlgmr.msra.gmra.mrb[0].mxu1 %v955_v2 }
  0x6c   : > { %651 = vmatmul.mubr.bf16.vlgmr.msra.gmra.mrb[0].mxu0 %v958_v3 }
 0x13e   : > { %v609_v4 = vpop.f32.mrb[0].mxu1 }
 0x13f   : > { %v652_v5 = vpop.f32.mrb[0].mxu0  ;;  %v611_v7 = vpop.f32.mrb[1].mxu1 }
 0x140   : > { %v653_v6 = vadd.f32 %v652_v5, %v609_v4  ;;  %v654_v8 = vpop.f32.mrb[1].mxu0  ;;  %v613_v10 = vpop.f32.mrb[2].mxu1 }
 0x141   : > { %v655_v9 = vadd.f32 %v654_v8, %v611_v7  ;;  %v656_v11 = vpop.f32.mrb[2].mxu0  ;;  %v615_v13 = vpop.f32.mrb[3].mxu1 }
 0x142   : > { %v657_v12 = vadd.f32 %v656_v11, %v613_v10  ;;  %v658_v14 = vpop.f32.mrb[3].mxu0 }
 0x143   : > { %v832_v15 = vpack.c.bf16 %v655_v9, %v653_v6  ;;  %v659_v16 = vadd.f32 %v658_v14, %v615_v13 }
 0x145   : > { %673 = vst [vmem:[%s165_s8] sm:$0xff] %v832_v15  ;;  %v833_v17 = vpack.c.bf16 %v659_v16, %v657_v12 }
 0x147   : > { %674 = vst [vmem:[%s165_s8 + $0x8] sm:$0xff] %v833_v17 }
 0x148 PF: > { %s13_s9 = sadd.s32 1, %s999_s9  }
 0x149   : > { %p10_p3 = scmp.ge.s32.totalorder %s13_s9, 6  }
 0x14b   :  { %12 = sbr.rel (!%p10_p3) target bundleno = 1 (0x1), region = 63 }
 0x152   :  { %699 = vsyncpa [#allocation3], 1 }
 0x153   :  { %701 = vsyncpa [#allocation3 + $0x1], 1 }

// kernel: tile.43
= control target key start
LH: loop header
LB: loop body
LE: loop exit
PB: predicated region body
PF: predicated region fallthrough
CT: control target
= control target key end

     0   :  { %vm7_vm0 = vcmask 523264   ;;  %vm13_vm1 = vcmask 1048064   ;;  %s39_s0 = inlined_call_operand.vmem [shape: f32[2,64], index: 0, kind: input, shape index: {}]   ;;  %s40_s1 = inlined_call_operand.vmem [shape: f32[1,128], index: 1, kind: output, shape index: {}]  }
   0x1   :  { %v4_v0 = vld [vmem:[%s39_s0] sm:$0x3]  ;;  %s22_s0 = smov 64  }
   0x2   :  { %5 = vst [vmem:[#allocation1] sm:$0x3] %v4_v0 }
   0x9   :  { %v10_v1 = vld [vmem:[#allocation1 + $0x1] sm:$0x1]   ;;  %v6_v2 = vld [vmem:[#allocation1] sm:$0x1]  }
   0xa   :  { %11 = vrot.lane.b32.xlu0 %v10_v1, %s22_s0  ;;  %8 = vst.msk [vmem:[#allocation0] sm:$0x1] %vm7_vm0, %v6_v2  }
  0x7c   :  { %v12_v3 = vpop.permute.xlu0 %11  }
  0x7d   :  { %14 = vst.msk [vmem:[#allocation0] sm:$0x1] %vm13_vm1, %v12_v3  }
  0x84   :  { %v18_v4 = vld [vmem:[#allocation0] sm:$0x1] }
  0x85   :  { %20 = vst [vmem:[%s40_s1] sm:$0x1] %v18_v4 }

// kernel: tile.42
= control target key start
LH: loop header
LB: loop body
LE: loop exit
PB: predicated region body
PF: predicated region fallthrough
CT: control target
= control target key end

     0   :  { %s22_s0 = inlined_call_operand.vmem [shape: f32[64], index: 0, kind: input, shape index: {}]   ;;  %s23_s1 = inlined_call_operand.vmem [shape: f32[2,64], index: 1, kind: output, shape index: {}]  }
   0x1   :  { %v4_v0 = vld [vmem:[%s22_s0] ss:$0 sm:$0xff] }
   0x2   :  { %5 = vst [vmem:[%s23_s1] sm:$0x3] %v4_v0 }

// kernel: generator_forward.12
= control target key start
LH: loop header
LB: loop body
LE: loop exit
PB: predicated region body
PF: predicated region fallthrough
CT: control target
= control target key end

     0   :  { %s326_s12 = smov 0   ;;  %s343_s0 = inlined_call_operand.vmem [shape: bf16[64,128], index: 0, kind: input, shape index: {}]   ;;  %s344_s1 = inlined_call_operand.vmem [shape: f32[1,128], index: 1, kind: input, shape index: {}]   ;;  %s345_s2 = inlined_call_operand.vmem [shape: f32[1,128], index: 2, kind: input, shape index: {}]   ;;  %s346_s3 = inlined_call_operand.vmem [shape: bf16[64,128], index: 3, kind: output, shape index: {}]  }
   0x1 LB: > { %s264_s13 = sadd.s32 4294967295, %s304_s12   ;;  %p268_p0 = scmp.ge.s32.totalorder %s304_s12, 1  ;;  %s304_s12 = sphi %s326_s12, %s13_s12  }
   0x2   : > { %p138_p1 = scmp.lt.s32.totalorder %s304_s12, 5 }
   0x4   : > { %p139_p2 = pnand %p268_p0, %p138_p1 }
   0x5   : > { %s269_s14 = sshll.u32 (!%p139_p2), %s264_s13, 1  ;;  %v273_v1 = vld [vmem:[%s344_s1] ss:$0 sm:$0xff] (!%p139_p2) }
   0x6   : > { %142 = sbr.rel (%p139_p2) target bundleno = 28 (0x1c), region = 32  ;;  %p163_p3 = scmp.lt.s32.totalorder (!%p139_p2), %s269_s14, 7  ;;  %v274_v4 = vld [vmem:[%s345_s2] ss:$0 sm:$0xff] (!%p139_p2) }
   0xd   : > { %s348_s14 = smov (!%p163_p3, %s269_s14), 7 }
   0xe   : > { %s270_s15 = sshll.u32 %s348_s14, 2 }
   0xf   : > { %s166_s18 = scalar_lea.vmem %s343_s0, %s270_s15  ;;  %s172_s25 = scalar_lea.vmem %s346_s3, %s270_s15 }
  0x10   : > { %v282_v0 = vld [vmem:[%s166_s18] sm:$0xff]  }
  0x11   : > { %v283_v2 = vunpack.c.l.bf16 %v282_v0  ;;  %v284_v3 = vunpack.c.h.bf16 %v282_v0 }
  0x13   : > { %v185_v5 = vmul.f32 %v283_v2, %v273_v1  ;;  %v186_v6 = vmul.f32 %v284_v3, %v273_v1 }
  0x15   : > { %v194_v7 = vadd.f32 %v274_v4, %v185_v5  ;;  %v195_v8 = vadd.f32 %v274_v4, %v186_v6 }
  0x17   : > { %v196_v9 = vmax.f32 %v194_v7, 0.0  ;;  %v197_v10 = vmax.f32 %v195_v8, 0.0 }
  0x19   : > { %v288_v11 = vpack.c.bf16 %v197_v10, %v196_v9 }
  0x1b   : > { %289 = vst [vmem:[%s172_s25] sm:$0xff] %v288_v11  }
  0x1c PF: > { %s13_s12 = sadd.s32 1, %s304_s12  }
  0x1d   : > { %p10_p4 = scmp.ge.s32.totalorder %s13_s12, 6  }
  0x1f   :  { %12 = sbr.rel (!%p10_p4) target bundleno = 1 (0x1), region = 62 }

// kernel: generator_forward.13
= control target key start
LH: loop header
LB: loop body
LE: loop exit
PB: predicated region body
PF: predicated region fallthrough
CT: control target
= control target key end

     0   :  { %s626_s9 = smov 0   ;;  %s703_s0 = inlined_call_operand.vmem [shape: bf16[192,256], index: 0, kind: input, shape index: {}]   ;;  %s704_s1 = inlined_call_operand.vmem [shape: bf16[256,128], index: 1, kind: input, shape index: {}]   ;;  %s705_s2 = inlined_call_operand.vmem [shape: bf16[192,128], index: 2, kind: output, shape index: {}]  }
   0x1 LB: > { %s458_s10 = sadd.s32 4294967295, %s609_s9   ;;  %p462_p0 = scmp.ge.s32.totalorder %s609_s9, 1  ;;  %s609_s9 = sphi %s626_s9, %s12_s9  }
   0x2   : > { %p114_p1 = scmp.lt.s32.totalorder %s609_s9, 5 }
   0x4   : > { %p115_p2 = pnand %p462_p0, %p114_p1 }
   0x5   : > { %v578_v0 = vld [vmem:[%s704_s1 + $0x40] sm:$0xff] (!%p115_p2)   ;;  %s137_s13 = smul.u32 (!%p115_p2), 6, %s458_s10  ;;  %v580_v2 = vld [vmem:[%s704_s1 + $0x48] sm:$0xff] (!%p115_p2)   ;;  %v582_v4 = vld [vmem:[%s704_s1 + $0x50] sm:$0xff] (!%p115_p2)  }
   0x6   : > { %118 = sbr.rel (%p115_p2) target bundleno = 266 (0x10a), region = 28  ;;  %v579_v1 = vld [vmem:[%s704_s1] sm:$0xff] (!%p115_p2)   ;;  %554 = vmatprep.subr.bf16.mxu1 (!%p115_p2), %v578_v0  ;;  %520 = vmatprep.subr.bf16.mxu0 (!%p115_p2), %v578_v0  ;;  %v581_v3 = vld [vmem:[%s704_s1 + $0x8] sm:$0xff] (!%p115_p2)   ;;  %v583_v5 = vld [vmem:[%s704_s1 + $0x10] sm:$0xff] (!%p115_p2)  }
   0x7   : > { %562 = vmatpush3.bf16.msra.mxu1 (!%p115_p2), %v579_v1  ;;  %521 = vmatpush3.bf16.msra.mxu0 (!%p115_p2), %v579_v1  ;;  %p138_p3 = scmp.lt.s32.totalorder (!%p115_p2), %s137_s13, 23  ;;  %v584_v6 = vld [vmem:[%s704_s1 + $0x58] sm:$0xff] (!%p115_p2)   ;;  %v586_v8 = vld [vmem:[%s704_s1 + $0x60] sm:$0xff] (!%p115_p2)   ;;  %v588_v10 = vld [vmem:[%s704_s1 + $0x68] sm:$0xff] (!%p115_p2)  }
   0x8   : > { %555 = vmatprep.subr.bf16.mxu1 (!%p115_p2), %v580_v2  ;;  %522 = vmatprep.subr.bf16.mxu0 (!%p115_p2), %v580_v2  ;;  %v585_v7 = vld [vmem:[%s704_s1 + $0x18] sm:$0xff] (!%p115_p2)   ;;  %v587_v9 = vld [vmem:[%s704_s1 + $0x20] sm:$0xff] (!%p115_p2)   ;;  %v589_v13 = vld [vmem:[%s704_s1 + $0x28] sm:$0xff] (!%p115_p2)  }
   0x9   : > { %v590_v14 = vld [vmem:[%s704_s1 + $0x70] sm:$0xff] (!%p115_p2)   ;;  %v592_v16 = vld [vmem:[%s704_s1 + $0x78] sm:$0xff] (!%p115_p2)  }
   0xa   : > { %v591_v15 = vld [vmem:[%s704_s1 + $0x30] sm:$0xff] (!%p115_p2)   ;;  %v593_v17 = vld [vmem:[%s704_s1 + $0x38] sm:$0xff] (!%p115_p2)  }
   0xb   : > { %563 = vmatpush3.bf16.msra.mxu1 (!%p115_p2), %v581_v3  ;;  %523 = vmatpush3.bf16.msra.mxu0 (!%p115_p2), %v581_v3 }
   0xc   : > { %556 = vmatprep.subr.bf16.mxu1 (!%p115_p2), %v582_v4  ;;  %524 = vmatprep.subr.bf16.mxu0 (!%p115_p2), %v582_v4 }
   0xd   : > { %s707_s13 = smov (!%p138_p3, %s137_s13), 23 }
   0xe   : > { %s496_s28 = sshll.u32 %s707_s13, 3  ;;  %s465_s22 = sshll.u32 %s707_s13, 2 }
   0xf   : > { %564 = vmatpush3.bf16.msra.mxu1 %v583_v5  ;;  %525 = vmatpush3.bf16.msra.mxu0 %v583_v5  ;;  %s667_s5 = scalar_lea.vmem %s703_s0, %s496_s28  ;;  %s148_s25 = scalar_lea.vmem %s705_s2, %s465_s22 }
  0x10   : > { %557 = vmatprep.subr.bf16.mxu1 %v584_v6  ;;  %526 = vmatprep.subr.bf16.mxu0 %v584_v6  ;;  %v596_v11 = vld [vmem:[%s667_s5 + $0x14] ss:$8 sps:$4 sm:$0xff]   ;;  %v599_v12 = vld [vmem:[%s667_s5 + $0x4] ss:$8 sps:$4 sm:$0xff]   ;;  %v594_v18 = vld [vmem:[%s667_s5 + $0x10] ss:$8 sps:$4 sm:$0xff]  }
  0x11   : > { %355 = vmatprep.mubr.bf16.mxu1 %v596_v11  ;;  %347 = vmatprep.mubr.bf16.mxu0 %v599_v12  ;;  %v597_v19 = vld [vmem:[%s667_s5] ss:$8 sps:$4 sm:$0xff]   ;;  %v600_v20 = vld [vmem:[%s667_s5 + $0x24] ss:$8 sps:$4 sm:$0xff]  }
  0x12   : > { %v602_v21 = vld [vmem:[%s667_s5 + $0x20] ss:$8 sps:$4 sm:$0xff]  }
  0x13   : > { %565 = vmatpush3.bf16.msra.mxu1 %v585_v7  ;;  %527 = vmatpush3.bf16.msra.mxu0 %v585_v7 }
  0x14   : > { %558 = vmatprep.subr.bf16.mxu1 %v586_v8  ;;  %528 = vmatprep.subr.bf16.mxu0 %v586_v8 }
  0x17   : > { %566 = vmatpush3.bf16.msra.mxu1 %v587_v9  ;;  %529 = vmatpush3.bf16.msra.mxu0 %v587_v9 }
  0x18   : > { %559 = vmatprep.subr.bf16.mxu1 %v588_v10  ;;  %530 = vmatprep.subr.bf16.mxu0 %v588_v10 }
  0x1b   : > { %567 = vmatpush3.bf16.msra.mxu1 %v589_v13  ;;  %531 = vmatpush3.bf16.msra.mxu0 %v589_v13 }
  0x1c   : > { %560 = vmatprep.subr.bf16.mxu1 %v590_v14  ;;  %532 = vmatprep.subr.bf16.mxu0 %v590_v14 }
  0x1f   : > { %568 = vmatpush3.bf16.msra.mxu1 %v591_v15  ;;  %533 = vmatpush3.bf16.msra.mxu0 %v591_v15 }
  0x20   : > { %561 = vmatprep.subr.bf16.mxu1 %v592_v16  ;;  %534 = vmatprep.subr.bf16.mxu0 %v592_v16 }
  0x23   : > { %569 = vmatpush3.bf16.msra.mxu1 %v593_v17  ;;  %535 = vmatpush3.bf16.msra.mxu0 %v593_v17 }
  0x26   : > { %356 = vmatmul.mubr.bf16.vlgmr.msra.gmra.mrb[0].mxu1 %v594_v18  ;;  %348 = vmatmul.mubr.bf16.vlgmr.msra.gmra.mrb[0].mxu0 %v597_v19 }
  0x27   : > { %363 = vmatprep.mubr.bf16.mxu1 %v600_v20 }
  0x2e   : > { %364 = vmatmul.mubr.bf16.gmra.mrb[4].mxu1 %v602_v21 }
  0xf9   : > { %v542_v22 = vpop.f32.mrb[0].mxu1  ;;  %v536_v23 = vpop.f32.mrb[0].mxu0 }
  0xfa   : > { %v543_v24 = vpop.f32.mrb[1].mxu1  ;;  %v537_v25 = vpop.f32.mrb[1].mxu0 }
  0xfb   : > { %v544_v26 = vadd.f32 %v543_v24, %v542_v22  ;;  %v545_v27 = vpop.f32.mrb[2].mxu1  ;;  %v538_v28 = vadd.f32 %v537_v25, %v536_v23  ;;  %v539_v29 = vpop.f32.mrb[2].mxu0 }
  0xfc   : > { %v546_v30 = vpop.f32.mrb[3].mxu1  ;;  %v540_v31 = vpop.f32.mrb[3].mxu0 }
  0xfd   : > { %v547_v32 = vadd.f32 %v546_v30, %v545_v27  ;;  %v541_v33 = vadd.f32 %v540_v31, %v539_v29 }
  0xff   : > { %v511_v34 = vpack.c.bf16 %v547_v32, %v544_v26  ;;  %v506_v35 = vpack.c.bf16 %v541_v33, %v538_v28 }
 0x101   : > { %518 = vst [vmem:[%s148_s25 + $0x8] sm:$0xff] %v511_v34   ;;  %507 = vst [vmem:[%s148_s25] sm:$0xff] %v506_v35   ;;  %v548_v36 = vpop.f32.mrb[4].mxu1 }
 0x102   : > { %v549_v37 = vpop.f32.mrb[5].mxu1 }
 0x103   : > { %v550_v38 = vadd.f32 %v549_v37, %v548_v36  ;;  %v551_v39 = vpop.f32.mrb[6].mxu1 }
 0x104   : > { %v552_v40 = vpop.f32.mrb[7].mxu1 }
 0x105   : > { %v553_v41 = vadd.f32 %v552_v40, %v551_v39 }
 0x107   : > { %v516_v42 = vpack.c.bf16 %v553_v41, %v550_v38 }
 0x109   : > { %519 = vst [vmem:[%s148_s25 + $0x10] sm:$0xff] %v516_v42  }
 0x10a PF: > { %s12_s9 = sadd.s32 1, %s609_s9  }
 0x10b   : > { %p9_p4 = scmp.ge.s32.totalorder %s12_s9, 6  }
 0x10d   :  { %11 = sbr.rel (!%p9_p4) target bundleno = 1 (0x1), region = 58 }

// kernel: tile.52
= control target key start
LH: loop header
LB: loop body
LE: loop exit
PB: predicated region body
PF: predicated region fallthrough
CT: control target
= control target key end

     0   :  { %s22_s0 = inlined_call_operand.vmem [shape: f32[32], index: 0, kind: input, shape index: {}]   ;;  %s23_s1 = inlined_call_operand.vmem [shape: f32[4,32], index: 1, kind: output, shape index: {}]  }
   0x1   :  { %v4_v0 = vld [vmem:[%s22_s0] ss:$0 sm:$0xff] }
   0x2   :  { %5 = vst [vmem:[%s23_s1] sm:$0xf] %v4_v0 }

// kernel: tile.53
= control target key start
LH: loop header
LB: loop body
LE: loop exit
PB: predicated region body
PF: predicated region fallthrough
CT: control target
= control target key end

     0   :  { %vm7_vm0 = vcmask 261120   ;;  %s37_s8 = smov 32   ;;  %s38_s9 = smov 64   ;;  %vm13_vm1 = vcmask 1048320   ;;  %vm19_vm2 = vcmask 785920   ;;  %vm25_vm3 = vcmask 523520   ;;  %s55_s0 = inlined_call_operand.vmem [shape: f32[4,32], index: 0, kind: input, shape index: {}]   ;;  %s56_s1 = inlined_call_operand.vmem [shape: f32[1,128], index: 1, kind: output, shape index: {}]  }
   0x1   :  { %v4_v0 = vld [vmem:[%s55_s0] sm:$0xf]  ;;  %s36_s0 = smov 96  }
   0x2   :  { %5 = vst [vmem:[#allocation1] sm:$0xf] %v4_v0 }
   0x9   :  { %v10_v1 = vld [vmem:[#allocation1 + $0x3] sm:$0x1]   ;;  %v22_v2 = vld [vmem:[#allocation1 + $0x1] sm:$0x1]   ;;  %v6_v3 = vld [vmem:[#allocation1] sm:$0x1]  }
   0xa   :  { %11 = vrot.lane.b32.xlu0 %v10_v1, %s36_s0  ;;  %23 = vrot.lane.b32.xlu1 %v22_v2, %s37_s8  ;;  %v16_v4 = vld [vmem:[#allocation1 + $0x2] sm:$0x1]   ;;  %8 = vst.msk [vmem:[#allocation0] sm:$0x1] %vm7_vm0, %v6_v3  }
   0xe   :  { %17 = vrot.lane.b32.xlu0 %v16_v4, %s38_s9 }
  0x7c   :  { %v12_v5 = vpop.permute.xlu0 %11   ;;  %v24_v6 = vpop.permute.xlu1 %23  }
  0x7d   :  { %14 = vst.msk [vmem:[#allocation0] sm:$0x1] %vm13_vm1, %v12_v5  }
  0x80   :  { %v18_v7 = vpop.permute.xlu0 %17  }
  0x81   :  { %20 = vst.msk [vmem:[#allocation0] sm:$0x1] %vm19_vm2, %v18_v7  }
  0x82   :  { %26 = vst.msk [vmem:[#allocation0] sm:$0x1] %vm25_vm3, %v24_v6  }
  0x89   :  { %v30_v8 = vld [vmem:[#allocation0] sm:$0x1] }
  0x8a   :  { %32 = vst [vmem:[%s56_s1] sm:$0x1] %v30_v8 }

// kernel: generator_forward.14
= control target key start
LH: loop header
LB: loop body
LE: loop exit
PB: predicated region body
PF: predicated region fallthrough
CT: control target
= control target key end

     0   :  { %s361_s12 = smov 0   ;;  %s384_s0 = inlined_call_operand.vmem [shape: bf16[128,128], index: 0, kind: input, shape index: {}]   ;;  %s385_s1 = inlined_call_operand.vmem [shape: f32[1,128], index: 1, kind: input, shape index: {}]   ;;  %s386_s2 = inlined_call_operand.vmem [shape: f32[1,128], index: 2, kind: input, shape index: {}]   ;;  %s387_s3 = inlined_call_operand.vmem [shape: bf16[128,128], index: 3, kind: output, shape index: {}]  }
   0x1 LB: > { %s284_s13 = sadd.s32 4294967295, %s339_s12   ;;  %p288_p0 = scmp.ge.s32.totalorder %s339_s12, 1  ;;  %s339_s12 = sphi %s361_s12, %s13_s12  }
   0x2   : > { %p138_p1 = scmp.lt.s32.totalorder %s339_s12, 5 }
   0x4   : > { %p139_p2 = pnand %p288_p0, %p138_p1 }
   0x5   : > { %s289_s14 = sshll.u32 (!%p139_p2), %s284_s13, 2  ;;  %v293_v2 = vld [vmem:[%s385_s1] ss:$0 sm:$0xff] (!%p139_p2) }
   0x6   : > { %142 = sbr.rel (%p139_p2) target bundleno = 28 (0x1c), region = 32  ;;  %p163_p3 = scmp.lt.s32.totalorder (!%p139_p2), %s289_s14, 15  ;;  %v294_v7 = vld [vmem:[%s386_s2] ss:$0 sm:$0xff] (!%p139_p2) }
   0xd   : > { %s389_s14 = smov (!%p163_p3, %s289_s14), 15 }
   0xe   : > { %s290_s15 = sshll.u32 %s389_s14, 2 }
   0xf   : > { %s166_s18 = scalar_lea.vmem %s384_s0, %s290_s15  ;;  %s172_s25 = scalar_lea.vmem %s387_s3, %s290_s15 }
  0x10   : > { %v306_v0 = vld [vmem:[%s166_s18] sm:$0xff]   ;;  %v323_v1 = vld [vmem:[%s166_s18 + $0x8] sm:$0xff]  }
  0x11   : > { %v307_v3 = vunpack.c.l.bf16 %v306_v0  ;;  %v308_v4 = vunpack.c.h.bf16 %v306_v0  ;;  %v311_v5 = vunpack.c.l.bf16 %v323_v1  ;;  %v312_v6 = vunpack.c.h.bf16 %v323_v1 }
  0x13   : > { %v189_v8 = vmul.f32 %v307_v3, %v293_v2  ;;  %v190_v9 = vmul.f32 %v308_v4, %v293_v2  ;;  %v191_v10 = vmul.f32 %v311_v5, %v293_v2  ;;  %v192_v11 = vmul.f32 %v312_v6, %v293_v2 }
  0x15   : > { %v200_v12 = vadd.f32 %v294_v7, %v189_v8  ;;  %v201_v13 = vadd.f32 %v294_v7, %v190_v9  ;;  %v202_v14 = vadd.f32 %v294_v7, %v191_v10  ;;  %v203_v15 = vadd.f32 %v294_v7, %v192_v11 }
  0x17   : > { %v204_v16 = vmax.f32 %v200_v12, 0.0  ;;  %v205_v17 = vmax.f32 %v201_v13, 0.0  ;;  %v206_v18 = vmax.f32 %v202_v14, 0.0  ;;  %v207_v19 = vmax.f32 %v203_v15, 0.0 }
  0x19   : > { %v316_v20 = vpack.c.bf16 %v205_v17, %v204_v16  ;;  %v321_v21 = vpack.c.bf16 %v207_v19, %v206_v18 }
  0x1b   : > { %317 = vst [vmem:[%s172_s25] sm:$0xff] %v316_v20   ;;  %324 = vst [vmem:[%s172_s25 + $0x8] sm:$0xff] %v321_v21  }
  0x1c PF: > { %s13_s12 = sadd.s32 1, %s339_s12  }
  0x1d   : > { %p10_p4 = scmp.ge.s32.totalorder %s13_s12, 6  }
  0x1f   :  { %12 = sbr.rel (!%p10_p4) target bundleno = 1 (0x1), region = 62 }

// kernel: generator_forward.15
= control target key start
LH: loop header
LB: loop body
LE: loop exit
PB: predicated region body
PF: predicated region fallthrough
CT: control target
= control target key end

     0   :  { %s806_s9 = smov 0   ;;  %s878_s0 = inlined_call_operand.vmem [shape: bf16[640,128], index: 0, kind: input, shape index: {}]   ;;  %s879_s1 = inlined_call_operand.vmem [shape: bf16[128,128], index: 1, kind: input, shape index: {}]   ;;  %s880_s2 = inlined_call_operand.vmem [shape: bf16[640,128], index: 2, kind: output, shape index: {}]  }
   0x1 LB: > { %s561_s10 = sadd.s32 4294967295, %s789_s9   ;;  %p565_p0 = scmp.ge.s32.totalorder %s789_s9, 1  ;;  %s789_s9 = sphi %s806_s9, %s12_s9  }
   0x2   : > { %p113_p1 = scmp.lt.s32.totalorder %s789_s9, 5 }
   0x4   : > { %p114_p2 = pnand %p565_p0, %p113_p1 }
   0x5   : > { %v765_v0 = vld [vmem:[%s879_s1] sm:$0xff] (!%p114_p2)   ;;  %s135_s13 = smul.u32 (!%p114_p2), 20, %s561_s10  ;;  %v766_v1 = vld [vmem:[%s879_s1 + $0x8] sm:$0xff] (!%p114_p2)   ;;  %v767_v2 = vld [vmem:[%s879_s1 + $0x10] sm:$0xff] (!%p114_p2)  }
   0x6   : > { %117 = sbr.rel (%p114_p2) target bundleno = 272 (0x110), region = 28  ;;  %705 = vmatprep.subr.bf16.mxu0 (!%p114_p2), %v765_v0  ;;  %741 = vmatprep.subr.bf16.mxu1 (!%p114_p2), %v765_v0  ;;  %v768_v3 = vld [vmem:[%s879_s1 + $0x18] sm:$0xff] (!%p114_p2)   ;;  %v769_v6 = vld [vmem:[%s879_s1 + $0x20] sm:$0xff] (!%p114_p2)   ;;  %v770_v7 = vld [vmem:[%s879_s1 + $0x28] sm:$0xff] (!%p114_p2)  }
   0x7   : > { %p136_p3 = scmp.lt.s32.totalorder (!%p114_p2), %s135_s13, 79  ;;  %706 = vmatpush3.bf16.msra.mxu0 (!%p114_p2), %v765_v0  ;;  %749 = vmatpush3.bf16.msra.mxu1 (!%p114_p2), %v765_v0  ;;  %v771_v8 = vld [vmem:[%s879_s1 + $0x30] sm:$0xff] (!%p114_p2)   ;;  %v772_v9 = vld [vmem:[%s879_s1 + $0x38] sm:$0xff] (!%p114_p2)  }
   0x8   : > { %707 = vmatprep.subr.bf16.mxu0 (!%p114_p2), %v766_v1  ;;  %742 = vmatprep.subr.bf16.mxu1 (!%p114_p2), %v766_v1 }
   0xb   : > { %708 = vmatpush3.bf16.msra.mxu0 (!%p114_p2), %v766_v1  ;;  %750 = vmatpush3.bf16.msra.mxu1 (!%p114_p2), %v766_v1 }
   0xc   : > { %709 = vmatprep.subr.bf16.mxu0 (!%p114_p2), %v767_v2  ;;  %743 = vmatprep.subr.bf16.mxu1 (!%p114_p2), %v767_v2 }
   0xd   : > { %s882_s13 = smov (!%p136_p3, %s135_s13), 79 }
   0xe   : > { %s566_s18 = sshll.u32 %s882_s13, 2 }
   0xf   : > { %s834_s23 = scalar_lea.vmem %s878_s0, %s566_s18  ;;  %710 = vmatpush3.bf16.msra.mxu0 %v767_v2  ;;  %751 = vmatpush3.bf16.msra.mxu1 %v767_v2  ;;  %s863_s6 = scalar_lea.vmem %s880_s2, %s566_s18 }
  0x10   : > { %v773_v4 = vld [vmem:[%s834_s23] sm:$0xff]   ;;  %v775_v5 = vld [vmem:[%s834_s23 + $0x30] sm:$0xff]   ;;  %711 = vmatprep.subr.bf16.mxu0 %v768_v3  ;;  %744 = vmatprep.subr.bf16.mxu1 %v768_v3  ;;  %v774_v10 = vld [vmem:[%s834_s23 + $0x8] sm:$0xff]  }
  0x11   : > { %721 = vmatprep.mubr.bf16.mxu0 %v773_v4  ;;  %733 = vmatprep.mubr.bf16.mxu1 %v775_v5  ;;  %v776_v11 = vld [vmem:[%s834_s23 + $0x38] sm:$0xff]   ;;  %v777_v12 = vld [vmem:[%s834_s23 + $0x10] sm:$0xff]   ;;  %v779_v13 = vld [vmem:[%s834_s23 + $0x40] sm:$0xff]  }
  0x12   : > { %v778_v14 = vld [vmem:[%s834_s23 + $0x18] sm:$0xff]   ;;  %v780_v15 = vld [vmem:[%s834_s23 + $0x48] sm:$0xff]   ;;  %v781_v16 = vld [vmem:[%s834_s23 + $0x20] sm:$0xff]  }
  0x13   : > { %712 = vmatpush3.bf16.msra.mxu0 %v768_v3  ;;  %752 = vmatpush3.bf16.msra.mxu1 %v768_v3  ;;  %v782_v17 = vld [vmem:[%s834_s23 + $0x28] sm:$0xff]  }
  0x14   : > { %713 = vmatprep.subr.bf16.mxu0 %v769_v6  ;;  %745 = vmatprep.subr.bf16.mxu1 %v769_v6 }
  0x17   : > { %714 = vmatpush3.bf16.msra.mxu0 %v769_v6  ;;  %753 = vmatpush3.bf16.msra.mxu1 %v769_v6 }
  0x18   : > { %715 = vmatprep.subr.bf16.mxu0 %v770_v7  ;;  %746 = vmatprep.subr.bf16.mxu1 %v770_v7 }
  0x1b   : > { %716 = vmatpush3.bf16.msra.mxu0 %v770_v7  ;;  %754 = vmatpush3.bf16.msra.mxu1 %v770_v7 }
  0x1c   : > { %717 = vmatprep.subr.bf16.mxu0 %v771_v8  ;;  %747 = vmatprep.subr.bf16.mxu1 %v771_v8 }
  0x1f   : > { %718 = vmatpush3.bf16.msra.mxu0 %v771_v8  ;;  %755 = vmatpush3.bf16.msra.mxu1 %v771_v8 }
  0x20   : > { %719 = vmatprep.subr.bf16.mxu0 %v772_v9  ;;  %748 = vmatprep.subr.bf16.mxu1 %v772_v9 }
  0x23   : > { %720 = vmatpush3.bf16.msra.mxu0 %v772_v9  ;;  %756 = vmatpush3.bf16.msra.mxu1 %v772_v9 }
  0x26   : > { %722 = vmatmul.mubr.bf16.vlgmr.msra.gmra.mrb[0].mxu0 %v774_v10  ;;  %734 = vmatmul.mubr.bf16.vlgmr.msra.gmra.mrb[0].mxu1 %v776_v11 }
  0x27   : > { %725 = vmatprep.mubr.bf16.mxu0 %v777_v12  ;;  %737 = vmatprep.mubr.bf16.mxu1 %v779_v13 }
  0x2e   : > { %726 = vmatmul.mubr.bf16.gmra.mrb[4].mxu0 %v778_v14  ;;  %738 = vmatmul.mubr.bf16.gmra.mrb[4].mxu1 %v780_v15 }
  0x2f   : > { %729 = vmatprep.mubr.bf16.mxu0 %v781_v16 }
  0x36   : > { %730 = vmatmul.mubr.bf16.gmra.mrb[8].mxu0 %v782_v17 }
  0xf9   : > { %v723_v18 = vpop.f32.mrb[0].mxu0  ;;  %v735_v19 = vpop.f32.mrb[0].mxu1 }
  0xfa   : > { %v326_v20 = vpop.f32.mrb[1].mxu0  ;;  %v374_v21 = vpop.f32.mrb[1].mxu1 }
  0xfb   : > { %v724_v22 = vpop.f32.mrb[2].mxu0  ;;  %v736_v23 = vpop.f32.mrb[2].mxu1 }
  0xfc   : > { %v636_v24 = vpack.c.bf16 %v724_v22, %v723_v18  ;;  %v329_v25 = vpop.f32.mrb[3].mxu0  ;;  %v666_v26 = vpack.c.bf16 %v736_v23, %v735_v19  ;;  %v377_v27 = vpop.f32.mrb[3].mxu1 }
  0xfd   : > { %v631_v28 = vpack.c.bf16 %v329_v25, %v326_v20  ;;  %v661_v29 = vpack.c.bf16 %v377_v27, %v374_v21 }
  0xfe   : > { %678 = vst [vmem:[%s863_s6 + $0x8] sm:$0xff] %v636_v24   ;;  %684 = vst [vmem:[%s863_s6 + $0x38] sm:$0xff] %v666_v26  }
  0xff   : > { %632 = vst [vmem:[%s863_s6] sm:$0xff] %v631_v28   ;;  %683 = vst [vmem:[%s863_s6 + $0x30] sm:$0xff] %v661_v29  }
 0x101   : > { %v727_v30 = vpop.f32.mrb[4].mxu0  ;;  %v739_v31 = vpop.f32.mrb[4].mxu1 }
 0x102   : > { %v342_v32 = vpop.f32.mrb[5].mxu0  ;;  %v390_v33 = vpop.f32.mrb[5].mxu1 }
 0x103   : > { %v728_v34 = vpop.f32.mrb[6].mxu0  ;;  %v740_v35 = vpop.f32.mrb[6].mxu1 }
 0x104   : > { %v646_v36 = vpack.c.bf16 %v728_v34, %v727_v30  ;;  %v345_v37 = vpop.f32.mrb[7].mxu0  ;;  %v676_v38 = vpack.c.bf16 %v740_v35, %v739_v31  ;;  %v393_v39 = vpop.f32.mrb[7].mxu1 }
 0x105   : > { %v641_v40 = vpack.c.bf16 %v345_v37, %v342_v32  ;;  %v671_v41 = vpack.c.bf16 %v393_v39, %v390_v33 }
 0x106   : > { %680 = vst [vmem:[%s863_s6 + $0x18] sm:$0xff] %v646_v36   ;;  %686 = vst [vmem:[%s863_s6 + $0x48] sm:$0xff] %v676_v38  }
 0x107   : > { %679 = vst [vmem:[%s863_s6 + $0x10] sm:$0xff] %v641_v40   ;;  %685 = vst [vmem:[%s863_s6 + $0x40] sm:$0xff] %v671_v41  }
 0x109   : > { %v731_v42 = vpop.f32.mrb[8].mxu0 }
 0x10a   : > { %v358_v43 = vpop.f32.mrb[9].mxu0 }
 0x10b   : > { %v732_v44 = vpop.f32.mrb[10].mxu0 }
 0x10c   : > { %v656_v45 = vpack.c.bf16 %v732_v44, %v731_v42  ;;  %v361_v46 = vpop.f32.mrb[11].mxu0 }
 0x10d   : > { %v651_v47 = vpack.c.bf16 %v361_v46, %v358_v43 }
 0x10e   : > { %682 = vst [vmem:[%s863_s6 + $0x28] sm:$0xff] %v656_v45  }
 0x10f   : > { %681 = vst [vmem:[%s863_s6 + $0x20] sm:$0xff] %v651_v47  }
 0x110 PF: > { %s12_s9 = sadd.s32 1, %s789_s9  }
 0x111   : > { %p9_p4 = scmp.ge.s32.totalorder %s12_s9, 6  }
 0x113   :  { %11 = sbr.rel (!%p9_p4) target bundleno = 1 (0x1), region = 58 }

// kernel: tile.62
= control target key start
LH: loop header
LB: loop body
LE: loop exit
PB: predicated region body
PF: predicated region fallthrough
CT: control target
= control target key end

     0   :  { %s22_s0 = inlined_call_operand.vmem [shape: f32[16], index: 0, kind: input, shape index: {}]   ;;  %s23_s1 = inlined_call_operand.vmem [shape: f32[8,16], index: 1, kind: output, shape index: {}]  }
   0x1   :  { %v4_v0 = vld [vmem:[%s22_s0] ss:$0 sm:$0xff] }
   0x2   :  { %5 = vst [vmem:[%s23_s1] sm:$0xff] %v4_v0 }

// kernel: tile.63
= control target key start
LH: loop header
LB: loop body
LE: loop exit
PB: predicated region body
PF: predicated region fallthrough
CT: control target
= control target key end

     0   :  { %s67_s10 = smov 112   ;;  %s68_s11 = smov 80   ;;  %vm3_vm0 = vcmask 130048   ;;  %vm9_vm1 = vcmask 1048448   ;;  %vm15_vm2 = vcmask 917248   ;;  %vm21_vm3 = vcmask 786048   ;;  %s111_s0 = inlined_call_operand.vmem [shape: f32[8,16], index: 0, kind: input, shape index: {}]   ;;  %s112_s1 = inlined_call_operand.vmem [shape: f32[1,128], index: 1, kind: output, shape index: {}]  }
   0x1   :  { %v53_v0 = vld [vmem:[%s111_s0 + $0x7] sm:$0x1]   ;;  %v55_v1 = vld [vmem:[%s111_s0 + $0x5] sm:$0x1]   ;;  %v54_v2 = vld [vmem:[%s111_s0 + $0x6] sm:$0x1]  }
   0x2   :  { %7 = vrot.lane.b32.xlu0 %v53_v0, %s67_s10  ;;  %19 = vrot.lane.b32.xlu1 %v55_v1, %s68_s11  ;;  %v56_v3 = vld [vmem:[%s111_s0 + $0x4] sm:$0x1]   ;;  %v2_v4 = vld [vmem:[%s111_s0] sm:$0x1]   ;;  %s69_s18 = smov 96   ;;  %s70_s19 = smov 64  }
   0x3   :  { %4 = vst.msk [vmem:[#allocation0] sm:$0x1] %vm3_vm0, %v2_v4   ;;  %v57_v5 = vld [vmem:[%s111_s0 + $0x3] sm:$0x1]   ;;  %v58_v6 = vld [vmem:[%s111_s0 + $0x2] sm:$0x1]  }
   0x4   :  { %s71_s24 = smov 48   ;;  %s72_s25 = smov 32   ;;  %v59_v7 = vld [vmem:[%s111_s0 + $0x1] sm:$0x1]   ;;  %vm27_vm4 = vcmask 654848   ;;  %vm33_vm5 = vcmask 523648  }
   0x5   :  { %s73_s0 = smov 16   ;;  %vm39_vm6 = vcmask 392448   ;;  %vm45_vm7 = vcmask 261248  }
   0x6   :  { %13 = vrot.lane.b32.xlu0 %v54_v2, %s69_s18  ;;  %25 = vrot.lane.b32.xlu1 %v56_v3, %s70_s19 }
   0xa   :  { %31 = vrot.lane.b32.xlu0 %v57_v5, %s71_s24  ;;  %37 = vrot.lane.b32.xlu1 %v58_v6, %s72_s25 }
   0xe   :  { %43 = vrot.lane.b32.xlu0 %v59_v7, %s73_s0 }
  0x74   :  { %v8_v8 = vpop.permute.xlu0 %7   ;;  %v20_v9 = vpop.permute.xlu1 %19  }
  0x75   :  { %10 = vst.msk [vmem:[#allocation0] sm:$0x1] %vm9_vm1, %v8_v8  }
  0x78   :  { %v14_v10 = vpop.permute.xlu0 %13   ;;  %v26_v11 = vpop.permute.xlu1 %25  }
  0x79   :  { %16 = vst.msk [vmem:[#allocation0] sm:$0x1] %vm15_vm2, %v14_v10  }
  0x7a   :  { %22 = vst.msk [vmem:[#allocation0] sm:$0x1] %vm21_vm3, %v20_v9  }
  0x7b   :  { %28 = vst.msk [vmem:[#allocation0] sm:$0x1] %vm27_vm4, %v26_v11  }
  0x7c   :  { %v32_v12 = vpop.permute.xlu0 %31   ;;  %v38_v13 = vpop.permute.xlu1 %37  }
  0x7d   :  { %34 = vst.msk [vmem:[#allocation0] sm:$0x1] %vm33_vm5, %v32_v12  }
  0x7e   :  { %40 = vst.msk [vmem:[#allocation0] sm:$0x1] %vm39_vm6, %v38_v13  }
  0x80   :  { %v44_v14 = vpop.permute.xlu0 %43  }
  0x81   :  { %46 = vst.msk [vmem:[#allocation0] sm:$0x1] %vm45_vm7, %v44_v14  }
  0x88   :  { %v50_v15 = vld [vmem:[#allocation0] sm:$0x1] }
  0x89   :  { %52 = vst [vmem:[%s112_s1] sm:$0x1] %v50_v15 }

// kernel: generator_forward.16
= control target key start
LH: loop header
LB: loop body
LE: loop exit
PB: predicated region body
PF: predicated region fallthrough
CT: control target
= control target key end

     0   :  { %s431_s12 = smov 0   ;;  %s461_s0 = inlined_call_operand.vmem [shape: bf16[256,128], index: 0, kind: input, shape index: {}]   ;;  %s462_s1 = inlined_call_operand.vmem [shape: f32[1,128], index: 1, kind: input, shape index: {}]   ;;  %s463_s2 = inlined_call_operand.vmem [shape: f32[1,128], index: 2, kind: input, shape index: {}]   ;;  %s464_s3 = inlined_call_operand.vmem [shape: bf16[256,128], index: 3, kind: output, shape index: {}]  }
   0x1 LB: > { %s324_s13 = sadd.s32 4294967295, %s409_s12   ;;  %p328_p0 = scmp.ge.s32.totalorder %s409_s12, 1  ;;  %s409_s12 = sphi %s431_s12, %s13_s12  }
   0x2   : > { %p138_p1 = scmp.lt.s32.totalorder %s409_s12, 5 }
   0x4   : > { %p139_p2 = pnand %p328_p0, %p138_p1 }
   0x5   : > { %s329_s14 = sshll.u32 (!%p139_p2), %s324_s13, 3  ;;  %v333_v0 = vld [vmem:[%s462_s1] ss:$0 sm:$0xff] (!%p139_p2) }
   0x6   : > { %142 = sbr.rel (%p139_p2) target bundleno = 29 (0x1d), region = 32  ;;  %p163_p3 = scmp.lt.s32.totalorder (!%p139_p2), %s329_s14, 31  ;;  %v334_v9 = vld [vmem:[%s463_s2] ss:$0 sm:$0xff] (!%p139_p2) }
   0xd   : > { %s466_s14 = smov (!%p163_p3, %s329_s14), 31 }
   0xe   : > { %s330_s15 = sshll.u32 %s466_s14, 2 }
   0xf   : > { %s166_s18 = scalar_lea.vmem %s461_s0, %s330_s15  ;;  %s172_s25 = scalar_lea.vmem %s464_s3, %s330_s15 }
  0x10   : > { %v354_v1 = vld [vmem:[%s166_s18] sm:$0xff]   ;;  %v389_v2 = vld [vmem:[%s166_s18 + $0x8] sm:$0xff]   ;;  %v390_v3 = vld [vmem:[%s166_s18 + $0x10] sm:$0xff]  }
  0x11   : > { %v355_v4 = vunpack.c.l.bf16 %v354_v1  ;;  %v356_v5 = vunpack.c.h.bf16 %v354_v1  ;;  %v359_v6 = vunpack.c.l.bf16 %v389_v2  ;;  %v360_v7 = vunpack.c.h.bf16 %v389_v2  ;;  %v391_v8 = vld [vmem:[%s166_s18 + $0x18] sm:$0xff]  }
  0x12   : > { %v363_v10 = vunpack.c.l.bf16 %v390_v3  ;;  %v364_v11 = vunpack.c.h.bf16 %v390_v3  ;;  %v367_v12 = vunpack.c.l.bf16 %v391_v8  ;;  %v368_v13 = vunpack.c.h.bf16 %v391_v8 }
  0x13   : > { %v197_v14 = vmul.f32 %v355_v4, %v333_v0  ;;  %v198_v15 = vmul.f32 %v356_v5, %v333_v0  ;;  %v199_v16 = vmul.f32 %v359_v6, %v333_v0  ;;  %v200_v17 = vmul.f32 %v360_v7, %v333_v0 }
  0x14   : > { %v201_v18 = vmul.f32 %v363_v10, %v333_v0  ;;  %v202_v19 = vmul.f32 %v364_v11, %v333_v0  ;;  %v203_v20 = vmul.f32 %v367_v12, %v333_v0  ;;  %v204_v21 = vmul.f32 %v368_v13, %v333_v0 }
  0x15   : > { %v212_v22 = vadd.f32 %v334_v9, %v197_v14  ;;  %v213_v23 = vadd.f32 %v334_v9, %v198_v15  ;;  %v214_v24 = vadd.f32 %v334_v9, %v199_v16  ;;  %v215_v25 = vadd.f32 %v334_v9, %v200_v17 }
  0x16   : > { %v216_v26 = vadd.f32 %v334_v9, %v201_v18  ;;  %v217_v27 = vadd.f32 %v334_v9, %v202_v19  ;;  %v218_v28 = vadd.f32 %v334_v9, %v203_v20  ;;  %v219_v29 = vadd.f32 %v334_v9, %v204_v21 }
  0x17   : > { %v220_v30 = vmax.f32 %v212_v22, 0.0  ;;  %v221_v31 = vmax.f32 %v213_v23, 0.0  ;;  %v222_v32 = vmax.f32 %v214_v24, 0.0  ;;  %v223_v33 = vmax.f32 %v215_v25, 0.0 }
  0x18   : > { %v224_v34 = vmax.f32 %v216_v26, 0.0  ;;  %v225_v35 = vmax.f32 %v217_v27, 0.0  ;;  %v226_v36 = vmax.f32 %v218_v28, 0.0  ;;  %v227_v37 = vmax.f32 %v219_v29, 0.0 }
  0x19   : > { %v372_v38 = vpack.c.bf16 %v221_v31, %v220_v30  ;;  %v377_v39 = vpack.c.bf16 %v223_v33, %v222_v32 }
  0x1a   : > { %v382_v40 = vpack.c.bf16 %v225_v35, %v224_v34  ;;  %v387_v41 = vpack.c.bf16 %v227_v37, %v226_v36 }
  0x1b   : > { %373 = vst [vmem:[%s172_s25] sm:$0xff] %v372_v38   ;;  %392 = vst [vmem:[%s172_s25 + $0x8] sm:$0xff] %v377_v39  }
  0x1c   : > { %393 = vst [vmem:[%s172_s25 + $0x10] sm:$0xff] %v382_v40   ;;  %394 = vst [vmem:[%s172_s25 + $0x18] sm:$0xff] %v387_v41  }
  0x1d PF: > { %s13_s12 = sadd.s32 1, %s409_s12  }
  0x1e   : > { %p10_p4 = scmp.ge.s32.totalorder %s13_s12, 6  }
  0x20   :  { %12 = sbr.rel (!%p10_p4) target bundleno = 1 (0x1), region = 62 }

// kernel: generator_forward.17
= control target key start
LH: loop header
LB: loop body
LE: loop exit
PB: predicated region body
PF: predicated region fallthrough
CT: control target
= control target key end

     0   :  { %s892_s12 = smov 0   ;;  %s1030_s0 = inlined_call_operand.vmem [shape: bf16[2304,64], index: 0, kind: input, shape index: {}]   ;;  %s1031_s1 = inlined_call_operand.vmem [shape: bf16[64,128], index: 1, kind: input, shape index: {}]   ;;  %s1032_s2 = inlined_call_operand.vmem [shape: f32[1,128], index: 2, kind: input, shape index: {}]   ;;  %s1033_s3 = inlined_call_operand.vmem [shape: f32[2304,128], index: 3, kind: output, shape index: {}]  }
   0x1 LB: > { %s656_s13 = sadd.s32 4294967295, %s870_s12   ;;  %p660_p0 = scmp.ge.s32.totalorder %s870_s12, 1  ;;  %s870_s12 = sphi %s892_s12, %s13_s12  }
   0x2   : > { %p138_p1 = scmp.lt.s32.totalorder %s870_s12, 10 }
   0x4   : > { %p139_p2 = pnand %p660_p0, %p138_p1 }
   0x5   : > { %v780_v0 = vld [vmem:[%s1031_s1] sm:$0xff] (!%p139_p2)   ;;  %s661_s16 = sshll.u32 (!%p139_p2), %s656_s13, 5  ;;  %v781_v1 = vld [vmem:[%s1031_s1 + $0x8] sm:$0xff] (!%p139_p2)   ;;  %v782_v2 = vld [vmem:[%s1031_s1 + $0x10] sm:$0xff] (!%p139_p2)   ;;  %vm326_vm0 = vcmask (!%p139_p2), 523264  }
   0x6   : > { %142 = sbr.rel (%p139_p2) target bundleno = 282 (0x11a), region = 32  ;;  %p163_p3 = scmp.lt.s32.totalorder (!%p139_p2), %s661_s16, 287  ;;  %724 = vmatprep.subr.bf16.mxu0 (!%p139_p2), %v780_v0  ;;  %764 = vmatprep.subr.bf16.mxu1 (!%p139_p2), %v780_v0  ;;  %v783_v3 = vld [vmem:[%s1031_s1 + $0x18] sm:$0xff] (!%p139_p2)   ;;  %v955_v20 = vld [vmem:[%s1032_s2] ss:$0 sm:$0xff] (!%p139_p2) }
   0x7   : > { %725 = vmatpush3.bf16.msra.mxu0 (!%p139_p2), %v780_v0  ;;  %768 = vmatpush3.bf16.msra.mxu1 (!%p139_p2), %v780_v0 }
   0x8   : > { %726 = vmatprep.subr.bf16.mxu0 (!%p139_p2), %v781_v1  ;;  %765 = vmatprep.subr.bf16.mxu1 (!%p139_p2), %v781_v1 }
   0xb   : > { %727 = vmatpush3.bf16.msra.mxu0 (!%p139_p2), %v781_v1  ;;  %769 = vmatpush3.bf16.msra.mxu1 (!%p139_p2), %v781_v1 }
   0xc   : > { %728 = vmatprep.subr.bf16.mxu0 (!%p139_p2), %v782_v2  ;;  %766 = vmatprep.subr.bf16.mxu1 (!%p139_p2), %v782_v2 }
   0xd   : > { %s1035_s16 = smov (!%p163_p3, %s661_s16), 287 }
   0xe   : > { %s662_s21 = sshll.u32 %s1035_s16, 2  ;;  %s664_s29 = sshll.u32 %s1035_s16, 3 }
   0xf   : > { %s918_s26 = scalar_lea.vmem %s1030_s0, %s662_s21  ;;  %729 = vmatpush3.bf16.msra.mxu0 %v782_v2  ;;  %770 = vmatpush3.bf16.msra.mxu1 %v782_v2  ;;  %s973_s5 = scalar_lea.vmem %s1033_s3, %s664_s29 }
  0x10   : > { %v784_v4 = vld [vmem:[%s918_s26] sm:$0xff]   ;;  %730 = vmatprep.subr.bf16.mxu0 %v783_v3  ;;  %767 = vmatprep.subr.bf16.mxu1 %v783_v3  ;;  %v786_v6 = vld [vmem:[%s918_s26 + $0x8] sm:$0xff]   ;;  %v788_v8 = vld [vmem:[%s918_s26 + $0x10] sm:$0xff]  }
  0x11   : > { %v785_v5 = vld [vmem:[%s918_s26 + $0x40] sm:$0xff]   ;;  %732 = vmatprep.mubr.msk.bf16.mxu0 %vm326_vm0, %v784_v4  ;;  %v787_v7 = vld [vmem:[%s918_s26 + $0x48] sm:$0xff]   ;;  %v789_v9 = vld [vmem:[%s918_s26 + $0x50] sm:$0xff]  }
  0x12   : > { %748 = vmatprep.mubr.msk.bf16.mxu1 %vm326_vm0, %v785_v5  ;;  %v790_v10 = vld [vmem:[%s918_s26 + $0x18] sm:$0xff]   ;;  %v792_v12 = vld [vmem:[%s918_s26 + $0x20] sm:$0xff]   ;;  %v794_v14 = vld [vmem:[%s918_s26 + $0x28] sm:$0xff]  }
  0x13   : > { %731 = vmatpush3.bf16.msra.mxu0 %v783_v3  ;;  %771 = vmatpush3.bf16.msra.mxu1 %v783_v3  ;;  %v791_v11 = vld [vmem:[%s918_s26 + $0x58] sm:$0xff]   ;;  %v793_v13 = vld [vmem:[%s918_s26 + $0x60] sm:$0xff]   ;;  %v795_v15 = vld [vmem:[%s918_s26 + $0x68] sm:$0xff]  }
  0x14   : > { %v796_v16 = vld [vmem:[%s918_s26 + $0x30] sm:$0xff]   ;;  %v798_v18 = vld [vmem:[%s918_s26 + $0x38] sm:$0xff]  }
  0x15   : > { %v797_v17 = vld [vmem:[%s918_s26 + $0x70] sm:$0xff]   ;;  %v799_v19 = vld [vmem:[%s918_s26 + $0x78] sm:$0xff]  }
  0x16   : > { %733 = vmatmul.mubr.msk.bf16.vlgmr.msra.gmra.mrb[0].mxu0 %vm326_vm0, %v786_v6  ;;  %749 = vmatmul.mubr.msk.bf16.vlgmr.msra.gmra.mrb[0].mxu1 %vm326_vm0, %v787_v7 }
  0x17   : > { %736 = vmatprep.mubr.msk.bf16.mxu0 %vm326_vm0, %v788_v8  ;;  %752 = vmatprep.mubr.msk.bf16.mxu1 %vm326_vm0, %v789_v9 }
  0x1e   : > { %737 = vmatmul.mubr.msk.bf16.gmra.mrb[4].mxu0 %vm326_vm0, %v790_v10  ;;  %753 = vmatmul.mubr.msk.bf16.gmra.mrb[4].mxu1 %vm326_vm0, %v791_v11 }
  0x1f   : > { %740 = vmatprep.mubr.msk.bf16.mxu0 %vm326_vm0, %v792_v12  ;;  %756 = vmatprep.mubr.msk.bf16.mxu1 %vm326_vm0, %v793_v13 }
  0x26   : > { %741 = vmatmul.mubr.msk.bf16.gmra.mrb[8].mxu0 %vm326_vm0, %v794_v14  ;;  %757 = vmatmul.mubr.msk.bf16.gmra.mrb[8].mxu1 %vm326_vm0, %v795_v15 }
  0x27   : > { %744 = vmatprep.mubr.msk.bf16.mxu0 %vm326_vm0, %v796_v16  ;;  %760 = vmatprep.mubr.msk.bf16.mxu1 %vm326_vm0, %v797_v17 }
  0x2e   : > { %745 = vmatmul.mubr.msk.bf16.gmra.mrb[12].mxu0 %vm326_vm0, %v798_v18  ;;  %761 = vmatmul.mubr.msk.bf16.gmra.mrb[12].mxu1 %vm326_vm0, %v799_v19 }
  0xe9   : > { %v734_v21 = vpop.f32.mrb[0].mxu0  ;;  %v750_v22 = vpop.f32.mrb[0].mxu1 }
  0xea   : > { %v418_v23 = vadd.f32 %v734_v21, %v955_v20  ;;  %v482_v24 = vadd.f32 %v750_v22, %v955_v20  ;;  %v409_v25 = vpop.f32.mrb[1].mxu0  ;;  %v473_v26 = vpop.f32.mrb[1].mxu1 }
  0xeb   : > { %v410_v27 = vadd.f32 %v955_v20, %v409_v25  ;;  %v474_v28 = vadd.f32 %v955_v20, %v473_v26  ;;  %v735_v29 = vpop.f32.mrb[2].mxu0  ;;  %v751_v30 = vpop.f32.mrb[2].mxu1 }
  0xec   : > { %800 = vtanh.f32 %v418_v23  ;;  %v421_v31 = vadd.f32 %v735_v29, %v955_v20  ;;  %v412_v32 = vpop.f32.mrb[3].mxu0  ;;  %v476_v33 = vpop.f32.mrb[3].mxu1  ;;  %v485_v34 = vadd.f32 %v751_v30, %v955_v20 }
  0xed   : > { %802 = vtanh.f32 %v482_v24  ;;  %v413_v35 = vadd.f32 %v955_v20, %v412_v32  ;;  %v477_v36 = vadd.f32 %v955_v20, %v476_v33 }
  0xee   : > { %804 = vtanh.f32 %v410_v27 }
  0xef   : > { %806 = vtanh.f32 %v474_v28 }
  0xf0   : > { %808 = vtanh.f32 %v421_v31 }
  0xf1   : > { %810 = vtanh.f32 %v485_v34  ;;  %v738_v37 = vpop.f32.mrb[4].mxu0  ;;  %v754_v38 = vpop.f32.mrb[4].mxu1 }
  0xf2   : > { %812 = vtanh.f32 %v413_v35  ;;  %v434_v39 = vadd.f32 %v738_v37, %v955_v20  ;;  %v498_v40 = vadd.f32 %v754_v38, %v955_v20  ;;  %v425_v41 = vpop.f32.mrb[5].mxu0  ;;  %v489_v42 = vpop.f32.mrb[5].mxu1 }
  0xf3   : > { %814 = vtanh.f32 %v477_v36  ;;  %v426_v43 = vadd.f32 %v955_v20, %v425_v41  ;;  %v490_v44 = vadd.f32 %v955_v20, %v489_v42  ;;  %v739_v45 = vpop.f32.mrb[6].mxu0  ;;  %v755_v46 = vpop.f32.mrb[6].mxu1 }
  0xf4   : > { %816 = vtanh.f32 %v434_v39  ;;  %v437_v47 = vadd.f32 %v739_v45, %v955_v20  ;;  %v428_v48 = vpop.f32.mrb[7].mxu0  ;;  %v492_v49 = vpop.f32.mrb[7].mxu1  ;;  %v501_v50 = vadd.f32 %v755_v46, %v955_v20 }
  0xf5   : > { %818 = vtanh.f32 %v498_v40  ;;  %v429_v52 = vadd.f32 %v955_v20, %v428_v48  ;;  %v493_v54 = vadd.f32 %v955_v20, %v492_v49 }
  0xf6   : > { %v801_v51 = vpop.eup %800  ;;  %820 = vtanh.f32 %v426_v43 }
  0xf7   : > { %v803_v53 = vpop.eup %802  ;;  %570 = vst [vmem:[%s973_s5 + $0x10] sm:$0xff] %v801_v51  ;;  %822 = vtanh.f32 %v490_v44 }
  0xf8   : > { %v805_v55 = vpop.eup %804  ;;  %586 = vst [vmem:[%s973_s5 + $0x90] sm:$0xff] %v803_v53  ;;  %824 = vtanh.f32 %v437_v47 }
  0xf9   : > { %v807_v56 = vpop.eup %806  ;;  %568 = vst [vmem:[%s973_s5] sm:$0xff] %v805_v55  ;;  %826 = vtanh.f32 %v501_v50  ;;  %v742_v57 = vpop.f32.mrb[8].mxu0 }
  0xfa   : > { %v758_v58 = vpop.f32.mrb[8].mxu1  ;;  %v809_v59 = vpop.eup %808  ;;  %584 = vst [vmem:[%s973_s5 + $0x80] sm:$0xff] %v807_v56  ;;  %828 = vtanh.f32 %v429_v52  ;;  %v450_v60 = vadd.f32 %v742_v57, %v955_v20 }
  0xfb   : > { %v514_v61 = vadd.f32 %v758_v58, %v955_v20  ;;  %v441_v62 = vpop.f32.mrb[9].mxu0  ;;  %v505_v63 = vpop.f32.mrb[9].mxu1  ;;  %571 = vst [vmem:[%s973_s5 + $0x18] sm:$0xff] %v809_v59  ;;  %830 = vtanh.f32 %v493_v54 }
  0xfc   : > { %v811_v0 = vpop.eup %810  ;;  %v442_v1 = vadd.f32 %v955_v20, %v441_v62  ;;  %v506_v2 = vadd.f32 %v955_v20, %v505_v63  ;;  %v743_v3 = vpop.f32.mrb[10].mxu0  ;;  %832 = vtanh.f32 %v450_v60 }
  0xfd   : > { %v759_v4 = vpop.f32.mrb[10].mxu1  ;;  %v813_v5 = vpop.eup %812  ;;  %587 = vst [vmem:[%s973_s5 + $0x98] sm:$0xff] %v811_v0  ;;  %v453_v6 = vadd.f32 %v743_v3, %v955_v20  ;;  %834 = vtanh.f32 %v514_v61 }
  0xfe   : > { %v444_v7 = vpop.f32.mrb[11].mxu0  ;;  %v508_v8 = vpop.f32.mrb[11].mxu1  ;;  %569 = vst [vmem:[%s973_s5 + $0x8] sm:$0xff] %v813_v5  ;;  %v517_v10 = vadd.f32 %v759_v4, %v955_v20  ;;  %836 = vtanh.f32 %v442_v1 }
  0xff   : > { %v815_v9 = vpop.eup %814  ;;  %v445_v12 = vadd.f32 %v955_v20, %v444_v7  ;;  %838 = vtanh.f32 %v506_v2  ;;  %v509_v14 = vadd.f32 %v955_v20, %v508_v8 }
 0x100   : > { %v817_v11 = vpop.eup %816  ;;  %585 = vst [vmem:[%s973_s5 + $0x88] sm:$0xff] %v815_v9  ;;  %840 = vtanh.f32 %v453_v6 }
 0x101   : > { %v819_v13 = vpop.eup %818  ;;  %574 = vst [vmem:[%s973_s5 + $0x30] sm:$0xff] %v817_v11  ;;  %842 = vtanh.f32 %v517_v10  ;;  %v746_v17 = vpop.f32.mrb[12].mxu0 }
 0x102   : > { %v821_v15 = vpop.eup %820  ;;  %590 = vst [vmem:[%s973_s5 + $0xb0] sm:$0xff] %v819_v13  ;;  %v762_v18 = vpop.f32.mrb[12].mxu1  ;;  %844 = vtanh.f32 %v445_v12  ;;  %v466_v21 = vadd.f32 %v746_v17, %v955_v20 }
 0x103   : > { %v823_v16 = vpop.eup %822  ;;  %572 = vst [vmem:[%s973_s5 + $0x20] sm:$0xff] %v821_v15  ;;  %v530_v22 = vadd.f32 %v762_v18, %v955_v20  ;;  %v457_v23 = vpop.f32.mrb[13].mxu0  ;;  %846 = vtanh.f32 %v509_v14 }
 0x104   : > { %v825_v19 = vpop.eup %824  ;;  %588 = vst [vmem:[%s973_s5 + $0xa0] sm:$0xff] %v823_v16  ;;  %v521_v24 = vpop.f32.mrb[13].mxu1  ;;  %v458_v26 = vadd.f32 %v955_v20, %v457_v23  ;;  %848 = vtanh.f32 %v466_v21 }
 0x105   : > { %v827_v25 = vpop.eup %826  ;;  %575 = vst [vmem:[%s973_s5 + $0x38] sm:$0xff] %v825_v19  ;;  %v522_v27 = vadd.f32 %v955_v20, %v521_v24  ;;  %v747_v28 = vpop.f32.mrb[14].mxu0  ;;  %850 = vtanh.f32 %v530_v22 }
 0x106   : > { %v763_v29 = vpop.f32.mrb[14].mxu1  ;;  %v829_v30 = vpop.eup %828  ;;  %591 = vst [vmem:[%s973_s5 + $0xb8] sm:$0xff] %v827_v25  ;;  %v469_v31 = vadd.f32 %v747_v28, %v955_v20  ;;  %852 = vtanh.f32 %v458_v26 }
 0x107   : > { %v460_v32 = vpop.f32.mrb[15].mxu0  ;;  %v524_v33 = vpop.f32.mrb[15].mxu1  ;;  %573 = vst [vmem:[%s973_s5 + $0x28] sm:$0xff] %v829_v30  ;;  %v533_v35 = vadd.f32 %v763_v29, %v955_v20  ;;  %854 = vtanh.f32 %v522_v27 }
 0x108   : > { %v831_v34 = vpop.eup %830  ;;  %v461_v37 = vadd.f32 %v955_v20, %v460_v32  ;;  %v525_v39 = vadd.f32 %v955_v20, %v524_v33  ;;  %856 = vtanh.f32 %v469_v31 }
 0x109   : > { %v833_v36 = vpop.eup %832  ;;  %589 = vst [vmem:[%s973_s5 + $0xa8] sm:$0xff] %v831_v34  ;;  %858 = vtanh.f32 %v533_v35 }
 0x10a   : > { %v835_v38 = vpop.eup %834  ;;  %578 = vst [vmem:[%s973_s5 + $0x50] sm:$0xff] %v833_v36  ;;  %860 = vtanh.f32 %v461_v37 }
 0x10b   : > { %v837_v40 = vpop.eup %836  ;;  %594 = vst [vmem:[%s973_s5 + $0xd0] sm:$0xff] %v835_v38  ;;  %862 = vtanh.f32 %v525_v39 }
 0x10c   : > { %v839_v41 = vpop.eup %838  ;;  %576 = vst [vmem:[%s973_s5 + $0x40] sm:$0xff] %v837_v40 }
 0x10d   : > { %v841_v42 = vpop.eup %840  ;;  %592 = vst [vmem:[%s973_s5 + $0xc0] sm:$0xff] %v839_v41 }
 0x10e   : > { %v843_v43 = vpop.eup %842  ;;  %579 = vst [vmem:[%s973_s5 + $0x58] sm:$0xff] %v841_v42 }
 0x10f   : > { %v845_v20 = vpop.eup %844  ;;  %595 = vst [vmem:[%s973_s5 + $0xd8] sm:$0xff] %v843_v43 }
 0x110   : > { %v847_v44 = vpop.eup %846  ;;  %577 = vst [vmem:[%s973_s5 + $0x48] sm:$0xff] %v845_v20 }
 0x111   : > { %v849_v45 = vpop.eup %848  ;;  %593 = vst [vmem:[%s973_s5 + $0xc8] sm:$0xff] %v847_v44 }
 0x112   : > { %v851_v46 = vpop.eup %850  ;;  %582 = vst [vmem:[%s973_s5 + $0x70] sm:$0xff] %v849_v45 }
 0x113   : > { %v853_v47 = vpop.eup %852  ;;  %598 = vst [vmem:[%s973_s5 + $0xf0] sm:$0xff] %v851_v46 }
 0x114   : > { %v855_v48 = vpop.eup %854  ;;  %580 = vst [vmem:[%s973_s5 + $0x60] sm:$0xff] %v853_v47 }
 0x115   : > { %v857_v49 = vpop.eup %856  ;;  %596 = vst [vmem:[%s973_s5 + $0xe0] sm:$0xff] %v855_v48 }
 0x116   : > { %v859_v50 = vpop.eup %858  ;;  %583 = vst [vmem:[%s973_s5 + $0x78] sm:$0xff] %v857_v49 }
 0x117   : > { %v861_v51 = vpop.eup %860  ;;  %599 = vst [vmem:[%s973_s5 + $0xf8] sm:$0xff] %v859_v50 }
 0x118   : > { %v863_v52 = vpop.eup %862  ;;  %581 = vst [vmem:[%s973_s5 + $0x68] sm:$0xff] %v861_v51 }
 0x119   : > { %597 = vst [vmem:[%s973_s5 + $0xe8] sm:$0xff] %v863_v52 }
 0x11a PF: > { %s13_s12 = sadd.s32 1, %s870_s12  }
 0x11b   : > { %p10_p4 = scmp.ge.s32.totalorder %s13_s12, 11  }
 0x11d   :  { %12 = sbr.rel (!%p10_p4) target bundleno = 1 (0x1), region = 62 }

</bundles_post_ra>
